<compile_context>
chip_gen: v7x
topology: tpu7x:2x2x1
jax: 0.10.0
libtpu: 0.0.40
codegen_flags: <defaults>
</compile_context>

<pallas_src>
import jax
import jax.numpy as jnp
from jax.experimental import pallas as pl
from jax.experimental.pallas import tpu as pltpu

# ---------------- model hyper-parameters (small, consistent with the module) -----------
N = 2            # batch
L = 8            # seq len (value_len == key_len == query_len)
E = 32           # embed_size
H = 4            # heads
D = E // H       # head_dim
FE = 2 * E       # forward_expansion * embed_size  (forward_expansion = 2)
NL = N * L       # 16
NHL = N * H * L  # 64
EPS = 1e-5       # nn.LayerNorm default eps
NEG = -1e30      # additive mask value

# ---------------- parameter-slab layout (row offsets, all multiples of 8; lanes at 0) ---
ROW_P3 = 0            # (96, 96) blockdiag(Wq.T/sqrt(E), Wk.T, Wv.T) per-head block-diag
ROW_R = 96            # (64, 16) head-expansion row-replication matrix
ROW_KVMASK = 160      # (64, 64) head-lane mask for widened [K | V]
ROW_SEGOUT = 224      # (64, 32) segment-sum -> output-lane matrix (softmax denominators)
ROW_WOT = 288         # (32, 32) fc_out weight (transposed)
ROW_W1T = 320         # (32, 64) feed-forward first linear (transposed)
ROW_W2T = 352         # (64, 32) feed-forward second linear (transposed)
ROW_ADDMASK = 416     # (16, 64) additive cross-batch mask (0 / -1e30)
ROW_BO = 432          # (1, 32)
ROW_GAMMA = 440       # (1, 32)
ROW_BETA = 448        # (1, 32)
ROW_B1 = 456          # (1, 64)
ROW_B2 = 464          # (1, 32)
SLAB_ROWS = 472


def transformer_block_kernel(act_ref, slab_ref, o_ref):
    f32 = jnp.float32
    act = act_ref[...]                                   # (16, 128) = [q | k | v | x]
    qkv = act[:, 0:3 * E]                                # (16, 96)
    x = act[:, 3 * E:4 * E]                              # (16, 32)

    # --- fused q/k/v per-head projection: ONE MXU pass (scale folded into wq block) ----
    p3 = slab_ref[ROW_P3:ROW_P3 + 3 * E, 0:3 * E]        # (96, 96)
    prj = jnp.dot(qkv, p3, preferred_element_type=f32)   # (16, 96) = [qp | kp | vp]
    qp = prj[:, 0:E]                                     # (16, 32), already * 1/sqrt(E)
    kvp = prj[:, E:3 * E]                                # (16, 64) = [kp | vp] (narrow)

    # --- in-kernel head expansion: one small MXU pass + constant lane mask -------------
    repl = slab_ref[ROW_R:ROW_R + NHL, 0:NL]             # (64, 16)
    kvmask = slab_ref[ROW_KVMASK:ROW_KVMASK + NHL, 0:2 * E]
    kvw = jnp.dot(repl, kvp, preferred_element_type=f32) * kvmask     # (64, 64)
    kp_w = kvw[:, 0:E]                                   # (64, 32) head-h lanes only
    vp_w = kvw[:, E:2 * E]                               # (64, 32)

    # --- block-diagonal attention: energy[(n,q), (n',h,k)] -----------------------------
    addmask = slab_ref[ROW_ADDMASK:ROW_ADDMASK + NL, 0:NHL]           # (16, 64)
    energy = jax.lax.dot_general(
        qp, kp_w, dimension_numbers=(((1,), (1,)), ((), ())),
        preferred_element_type=f32) + addmask            # (16, 64), NEG on other batch

    # Shared per-row max is a constant shift inside every (row, head) segment -> exact.
    # (A per-segment max would be more robust to >~88 inter-head logit gaps.)
    m = jnp.max(energy, axis=-1, keepdims=True)          # (16, 1)
    e = jnp.exp(energy - m)                              # exactly 0 on masked columns

    segout = slab_ref[ROW_SEGOUT:ROW_SEGOUT + NHL, 0:E]  # (64, 32)
    denom = jnp.dot(e, segout, preferred_element_type=f32)   # (16, 32) per-head sums
    numer = jnp.dot(e, vp_w, preferred_element_type=f32)     # (16, 32) unnormalized heads
    concat = numer / jnp.maximum(denom, 1e-30)           # exact division (no approx recip)

    wot = slab_ref[ROW_WOT:ROW_WOT + E, 0:E]
    bo = slab_ref[ROW_BO:ROW_BO + 1, 0:E]
    attn = jnp.dot(concat, wot, preferred_element_type=f32) + bo      # (16, 32)

    # --- shared LayerNorm (one nn.LayerNorm used twice); broadcasts hoisted once -------
    gamma = jnp.broadcast_to(slab_ref[ROW_GAMMA:ROW_GAMMA + 1, 0:E], (NL, E))
    beta = jnp.broadcast_to(slab_ref[ROW_BETA:ROW_BETA + 1, 0:E], (NL, E))

    def layernorm(y):
        mu = jnp.mean(y, axis=-1, keepdims=True)
        c = y - mu
        var = jnp.mean(c * c, axis=-1, keepdims=True)
        return c * jax.lax.rsqrt(var + EPS) * gamma + beta

    x1 = layernorm(attn + x)

    # --- feed-forward -------------------------------------------------------------------
    w1t = slab_ref[ROW_W1T:ROW_W1T + E, 0:FE]
    b1 = slab_ref[ROW_B1:ROW_B1 + 1, 0:FE]
    hid = jnp.maximum(jnp.dot(x1, w1t, preferred_element_type=f32) + b1, 0.0)
    w2t = slab_ref[ROW_W2T:ROW_W2T + FE, 0:E]
    b2 = slab_ref[ROW_B2:ROW_B2 + 1, 0:E]
    ff = jnp.dot(hid, w2t, preferred_element_type=f32) + b2

    o_ref[...] = layernorm(ff + x1).astype(o_ref.dtype)


def pack_params(Wv, Wk, Wq, Wo, bo, gamma, beta, W1, b1, W2, b2):
    """Build the single lane-padded f32 parameter/constant slab (done ONCE, not per call)."""
    f32 = jnp.float32
    eyeH = jnp.eye(H, dtype=f32)
    wqt = jnp.kron(eyeH, Wq.T) * (1.0 / float(E) ** 0.5)   # softmax scale folded in
    wkt = jnp.kron(eyeH, Wk.T)
    wvt = jnp.kron(eyeH, Wv.T)
    p3 = jnp.zeros((3 * E, 3 * E), f32)
    p3 = p3.at[0:E, 0:E].set(wqt)
    p3 = p3.at[E:2 * E, E:2 * E].set(wkt)
    p3 = p3.at[2 * E:3 * E, 2 * E:3 * E].set(wvt)

    r = jnp.arange(NHL)
    src = (r // (H * L)) * L + (r % L)                      # widened row (n,h,l) -> token row (n,l)
    repl = (src[:, None] == jnp.arange(NL)[None, :]).astype(f32)              # (64, 16)

    head_r = (r // L) % H
    kvmask = (head_r[:, None] == (jnp.arange(2 * E) % E) // D).astype(f32)    # (64, 64)
    segout = (head_r[:, None] == jnp.arange(E) // D).astype(f32)              # (64, 32)

    batch_q = jnp.arange(NL) // L
    batch_k = jnp.arange(NHL) // (H * L)
    addmask = jnp.where(batch_q[:, None] == batch_k[None, :], 0.0, NEG).astype(f32)  # (16, 64)

    slab = jnp.zeros((SLAB_ROWS, 128), f32)

    def put(s, row, mat):
        mat = jnp.asarray(mat, f32)
        return s.at[row:row + mat.shape[0], 0:mat.shape[1]].set(mat)

    slab = put(slab, ROW_P3, p3)
    slab = put(slab, ROW_R, repl)
    slab = put(slab, ROW_KVMASK, kvmask)
    slab = put(slab, ROW_SEGOUT, segout)
    slab = put(slab, ROW_WOT, Wo.T)
    slab = put(slab, ROW_W1T, W1.T)
    slab = put(slab, ROW_W2T, W2.T)
    slab = put(slab, ROW_ADDMASK, addmask)
    slab = put(slab, ROW_BO, bo.reshape(1, E))
    slab = put(slab, ROW_GAMMA, gamma.reshape(1, E))
    slab = put(slab, ROW_BETA, beta.reshape(1, E))
    slab = put(slab, ROW_B1, b1.reshape(1, FE))
    slab = put(slab, ROW_B2, b2.reshape(1, E))
    return slab


@jax.jit
def transformer_block(value, key, query, x, slab):
    # layout plumbing only (fused under jit): flatten and lane-concat to one (16,128) slab
    act = jnp.concatenate(
        [query.reshape(NL, E), key.reshape(NL, E),
         value.reshape(NL, E), x.reshape(NL, E)], axis=1)
    out = pl.pallas_call(
        transformer_block_kernel,
        out_shape=jax.ShapeDtypeStruct((NL, E), jnp.float32),
        in_specs=[pl.BlockSpec(memory_space=pltpu.MemorySpace.VMEM),
                  pl.BlockSpec(memory_space=pltpu.MemorySpace.VMEM)],
        out_specs=pl.BlockSpec(memory_space=pltpu.MemorySpace.VMEM),
    )(act, slab)
    return out.reshape(N, L, E)


# ---------------- pure-JAX reference (mirrors the PyTorch forward exactly) --------------
def reference(value, key, query, x, raw):
    Wv, Wk, Wq, Wo, bo, gamma, beta, W1, b1, W2, b2 = raw
    vh = value.reshape(N, L, H, D) @ Wv.T
    kh = key.reshape(N, L, H, D) @ Wk.T
    qh = query.reshape(N, L, H, D) @ Wq.T
    energy = jnp.einsum("nqhd,nkhd->nhqk", qh, kh)
    att = jax.nn.softmax(energy / (E ** 0.5), axis=3)
    out = jnp.einsum("nhql,nlhd->nqhd", att, vh).reshape(N, L, E)
    attn = out @ Wo.T + bo

    def ln(y):
        mu = jnp.mean(y, axis=-1, keepdims=True)
        var = jnp.mean((y - mu) ** 2, axis=-1, keepdims=True)
        return (y - mu) / jnp.sqrt(var + EPS) * gamma + beta

    x1 = ln(attn + x)
    ff = jax.nn.relu(x1 @ W1.T + b1) @ W2.T + b2
    return ln(ff + x1)


if __name__ == "__main__":
    # keep the f32 reference (and the kernel's dot precision attr) at full accuracy
    jax.config.update("jax_default_matmul_precision", "highest")

    root = jax.random.PRNGKey(0)
    keys = jax.random.split(root, 16)

    # deterministic parameter init (PyTorch Linear weight layout: (out, in))
    Wv = 0.1 * jax.random.normal(keys[0], (D, D), jnp.float32)
    Wk = 0.1 * jax.random.normal(keys[1], (D, D), jnp.float32)
    Wq = 0.1 * jax.random.normal(keys[2], (D, D), jnp.float32)
    Wo = 0.1 * jax.random.normal(keys[3], (E, E), jnp.float32)
    bo = 0.1 * jax.random.normal(keys[4], (E,), jnp.float32)
    gamma = 1.0 + 0.05 * jax.random.normal(keys[5], (E,), jnp.float32)
    beta = 0.05 * jax.random.normal(keys[6], (E,), jnp.float32)
    W1 = 0.1 * jax.random.normal(keys[7], (FE, E), jnp.float32)
    b1 = 0.1 * jax.random.normal(keys[8], (FE,), jnp.float32)
    W2 = 0.1 * jax.random.normal(keys[9], (E, FE), jnp.float32)
    b2 = 0.1 * jax.random.normal(keys[10], (E,), jnp.float32)

    # built once at parameter-setup time (NOT per call)
    slab = jax.block_until_ready(
        pack_params(Wv, Wk, Wq, Wo, bo, gamma, beta, W1, b1, W2, b2))

    value = jax.random.normal(keys[11], (N, L, E), jnp.float32)
    key_t = jax.random.normal(keys[12], (N, L, E), jnp.float32)
    query = jax.random.normal(keys[13], (N, L, E), jnp.float32)
    x_in = jax.random.normal(keys[14], (N, L, E), jnp.float32)

    out = jax.block_until_ready(transformer_block(value, key_t, query, x_in, slab))

    ref = reference(value, key_t, query, x_in,
                    (Wv, Wk, Wq, Wo, bo, gamma, beta, W1, b1, W2, b2))
    assert out.shape == (N, L, E)
    err = float(jnp.max(jnp.abs(out - ref)))
    assert jnp.allclose(out, ref, atol=5e-4, rtol=5e-4), err

    print("KERNEL_OK")
</pallas_src>

<mosaic_0001>
module attributes {stable_mosaic.version = 11 : i64} {
  func.func @transformer_block_kernel(%arg0: memref<16x128xf32, #tpu.memory_space<vmem>>, %arg1: memref<472x128xf32, #tpu.memory_space<vmem>>, %arg2: memref<16x32xf32, #tpu.memory_space<vmem>>) attributes {dimension_semantics = [], scalar_prefetch = 0 : i64, scratch_operands = 0 : i64, tpu.core_type = #tpu.core_type<tc>} {
    %c0 = arith.constant 0 : index
    %c0_0 = arith.constant 0 : index
    %0 = vector.load %arg0[%c0, %c0_0] : memref<16x128xf32, #tpu.memory_space<vmem>>, vector<16x128xf32>
    %1 = vector.extract_strided_slice %0 {offsets = [0, 0], sizes = [16, 96], strides = [1, 1]} : vector<16x128xf32> to vector<16x96xf32>
    %2 = vector.extract_strided_slice %0 {offsets = [0, 96], sizes = [16, 32], strides = [1, 1]} : vector<16x128xf32> to vector<16x32xf32>
    %c0_1 = arith.constant 0 : index
    %c0_2 = arith.constant 0 : index
    %3 = vector.load %arg1[%c0_1, %c0_2] : memref<472x128xf32, #tpu.memory_space<vmem>>, vector<96x96xf32>
    %cst = arith.constant dense<0.000000e+00> : vector<16x96xf32>
    %4 = tpu.matmul %1, %3, %cst {dimension_numbers = #tpu.dot_dimension_numbers<[1], [0], [0], [1], [0, 0, 1, 1], [], []>, precision = #tpu.contract_precision<fp32>} : vector<16x96xf32>, vector<96x96xf32>, vector<16x96xf32> -> vector<16x96xf32>
    %5 = vector.extract_strided_slice %4 {offsets = [0, 0], sizes = [16, 32], strides = [1, 1]} : vector<16x96xf32> to vector<16x32xf32>
    %6 = vector.extract_strided_slice %4 {offsets = [0, 32], sizes = [16, 64], strides = [1, 1]} : vector<16x96xf32> to vector<16x64xf32>
    %c96 = arith.constant 96 : index
    %c0_3 = arith.constant 0 : index
    %7 = vector.load %arg1[%c96, %c0_3] : memref<472x128xf32, #tpu.memory_space<vmem>>, vector<64x16xf32>
    %c160 = arith.constant 160 : index
    %c0_4 = arith.constant 0 : index
    %8 = vector.load %arg1[%c160, %c0_4] : memref<472x128xf32, #tpu.memory_space<vmem>>, vector<64x64xf32>
    %cst_5 = arith.constant dense<0.000000e+00> : vector<64x64xf32>
    %9 = tpu.matmul %7, %6, %cst_5 {dimension_numbers = #tpu.dot_dimension_numbers<[1], [0], [0], [1], [0, 0, 1, 1], [], []>, precision = #tpu.contract_precision<fp32>} : vector<64x16xf32>, vector<16x64xf32>, vector<64x64xf32> -> vector<64x64xf32>
    %10 = arith.mulf %9, %8 : vector<64x64xf32>
    %11 = vector.extract_strided_slice %10 {offsets = [0, 0], sizes = [64, 32], strides = [1, 1]} : vector<64x64xf32> to vector<64x32xf32>
    %12 = vector.extract_strided_slice %10 {offsets = [0, 32], sizes = [64, 32], strides = [1, 1]} : vector<64x64xf32> to vector<64x32xf32>
    %c416 = arith.constant 416 : index
    %c0_6 = arith.constant 0 : index
    %13 = vector.load %arg1[%c416, %c0_6] : memref<472x128xf32, #tpu.memory_space<vmem>>, vector<16x64xf32>
    %cst_7 = arith.constant dense<0.000000e+00> : vector<16x64xf32>
    %14 = tpu.matmul %5, %11, %cst_7 {dimension_numbers = #tpu.dot_dimension_numbers<[1], [1], [0], [0], [0, 0, 1, 0], [], []>, precision = #tpu.contract_precision<fp32>} : vector<16x32xf32>, vector<64x32xf32>, vector<16x64xf32> -> vector<16x64xf32>
    %15 = arith.addf %14, %13 : vector<16x64xf32>
    %cst_8 = arith.constant dense<0xFF800000> : vector<16xf32>
    %16 = vector.multi_reduction <maximumf>, %15, %cst_8 [1] : vector<16x64xf32> to vector<16xf32>
    %17 = vector.shape_cast %16 : vector<16xf32> to vector<16x1xf32>
    %18 = vector.broadcast %17 : vector<16x1xf32> to vector<16x64xf32>
    %19 = arith.subf %15, %18 : vector<16x64xf32>
    %20 = math.exp %19 : vector<16x64xf32>
    %c224 = arith.constant 224 : index
    %c0_9 = arith.constant 0 : index
    %21 = vector.load %arg1[%c224, %c0_9] : memref<472x128xf32, #tpu.memory_space<vmem>>, vector<64x32xf32>
    %cst_10 = arith.constant dense<0.000000e+00> : vector<16x32xf32>
    %22 = tpu.matmul %20, %21, %cst_10 {dimension_numbers = #tpu.dot_dimension_numbers<[1], [0], [0], [1], [0, 0, 1, 1], [], []>, precision = #tpu.contract_precision<fp32>} : vector<16x64xf32>, vector<64x32xf32>, vector<16x32xf32> -> vector<16x32xf32>
    %cst_11 = arith.constant dense<0.000000e+00> : vector<16x32xf32>
    %23 = tpu.matmul %20, %12, %cst_11 {dimension_numbers = #tpu.dot_dimension_numbers<[1], [0], [0], [1], [0, 0, 1, 1], [], []>, precision = #tpu.contract_precision<fp32>} : vector<16x64xf32>, vector<64x32xf32>, vector<16x32xf32> -> vector<16x32xf32>
    %cst_12 = arith.constant 1.000000e-30 : f32
    %24 = vector.broadcast %cst_12 : f32 to vector<16x32xf32>
    %25 = arith.maximumf %22, %24 : vector<16x32xf32>
    %26 = arith.divf %23, %25 : vector<16x32xf32>
    %c288 = arith.constant 288 : index
    %c0_13 = arith.constant 0 : index
    %27 = vector.load %arg1[%c288, %c0_13] : memref<472x128xf32, #tpu.memory_space<vmem>>, vector<32x32xf32>
    %c432 = arith.constant 432 : index
    %c0_14 = arith.constant 0 : index
    %28 = vector.load %arg1[%c432, %c0_14] : memref<472x128xf32, #tpu.memory_space<vmem>>, vector<1x32xf32>
    %cst_15 = arith.constant dense<0.000000e+00> : vector<16x32xf32>
    %29 = tpu.matmul %26, %27, %cst_15 {dimension_numbers = #tpu.dot_dimension_numbers<[1], [0], [0], [1], [0, 0, 1, 1], [], []>, precision = #tpu.contract_precision<fp32>} : vector<16x32xf32>, vector<32x32xf32>, vector<16x32xf32> -> vector<16x32xf32>
    %30 = vector.broadcast %28 : vector<1x32xf32> to vector<16x32xf32>
    %31 = arith.addf %29, %30 : vector<16x32xf32>
    %c440 = arith.constant 440 : index
    %c0_16 = arith.constant 0 : index
    %32 = vector.load %arg1[%c440, %c0_16] : memref<472x128xf32, #tpu.memory_space<vmem>>, vector<1x32xf32>
    %33 = vector.shape_cast %32 : vector<1x32xf32> to vector<1x32xf32>
    %34 = vector.broadcast %33 : vector<1x32xf32> to vector<16x32xf32>
    %c448 = arith.constant 448 : index
    %c0_17 = arith.constant 0 : index
    %35 = vector.load %arg1[%c448, %c0_17] : memref<472x128xf32, #tpu.memory_space<vmem>>, vector<1x32xf32>
    %36 = vector.shape_cast %35 : vector<1x32xf32> to vector<1x32xf32>
    %37 = vector.broadcast %36 : vector<1x32xf32> to vector<16x32xf32>
    %38 = arith.addf %31, %2 : vector<16x32xf32>
    %cst_18 = arith.constant dense<0.000000e+00> : vector<16xf32>
    %39 = vector.multi_reduction <add>, %38, %cst_18 [1] : vector<16x32xf32> to vector<16xf32>
    %40 = vector.shape_cast %39 : vector<16xf32> to vector<16x1xf32>
    %cst_19 = arith.constant 3.200000e+01 : f32
    %41 = vector.broadcast %cst_19 : f32 to vector<16x1xf32>
    %42 = arith.divf %40, %41 : vector<16x1xf32>
    %43 = vector.broadcast %42 : vector<16x1xf32> to vector<16x32xf32>
    %44 = arith.subf %38, %43 : vector<16x32xf32>
    %45 = arith.mulf %44, %44 : vector<16x32xf32>
    %cst_20 = arith.constant dense<0.000000e+00> : vector<16xf32>
    %46 = vector.multi_reduction <add>, %45, %cst_20 [1] : vector<16x32xf32> to vector<16xf32>
    %47 = vector.shape_cast %46 : vector<16xf32> to vector<16x1xf32>
    %cst_21 = arith.constant 3.200000e+01 : f32
    %48 = vector.broadcast %cst_21 : f32 to vector<16x1xf32>
    %49 = arith.divf %47, %48 : vector<16x1xf32>
    %cst_22 = arith.constant 9.99999974E-6 : f32
    %50 = vector.broadcast %cst_22 : f32 to vector<16x1xf32>
    %51 = arith.addf %49, %50 : vector<16x1xf32>
    %52 = math.rsqrt %51 : vector<16x1xf32>
    %53 = vector.broadcast %52 : vector<16x1xf32> to vector<16x32xf32>
    %54 = arith.mulf %44, %53 : vector<16x32xf32>
    %55 = arith.mulf %54, %34 : vector<16x32xf32>
    %56 = arith.addf %55, %37 : vector<16x32xf32>
    %c320 = arith.constant 320 : index
    %c0_23 = arith.constant 0 : index
    %57 = vector.load %arg1[%c320, %c0_23] : memref<472x128xf32, #tpu.memory_space<vmem>>, vector<32x64xf32>
    %c456 = arith.constant 456 : index
    %c0_24 = arith.constant 0 : index
    %58 = vector.load %arg1[%c456, %c0_24] : memref<472x128xf32, #tpu.memory_space<vmem>>, vector<1x64xf32>
    %cst_25 = arith.constant dense<0.000000e+00> : vector<16x64xf32>
    %59 = tpu.matmul %56, %57, %cst_25 {dimension_numbers = #tpu.dot_dimension_numbers<[1], [0], [0], [1], [0, 0, 1, 1], [], []>, precision = #tpu.contract_precision<fp32>} : vector<16x32xf32>, vector<32x64xf32>, vector<16x64xf32> -> vector<16x64xf32>
    %60 = vector.broadcast %58 : vector<1x64xf32> to vector<16x64xf32>
    %61 = arith.addf %59, %60 : vector<16x64xf32>
    %cst_26 = arith.constant 0.000000e+00 : f32
    %62 = vector.broadcast %cst_26 : f32 to vector<16x64xf32>
    %63 = arith.maximumf %61, %62 : vector<16x64xf32>
    %c352 = arith.constant 352 : index
    %c0_27 = arith.constant 0 : index
    %64 = vector.load %arg1[%c352, %c0_27] : memref<472x128xf32, #tpu.memory_space<vmem>>, vector<64x32xf32>
    %c464 = arith.constant 464 : index
    %c0_28 = arith.constant 0 : index
    %65 = vector.load %arg1[%c464, %c0_28] : memref<472x128xf32, #tpu.memory_space<vmem>>, vector<1x32xf32>
    %cst_29 = arith.constant dense<0.000000e+00> : vector<16x32xf32>
    %66 = tpu.matmul %63, %64, %cst_29 {dimension_numbers = #tpu.dot_dimension_numbers<[1], [0], [0], [1], [0, 0, 1, 1], [], []>, precision = #tpu.contract_precision<fp32>} : vector<16x64xf32>, vector<64x32xf32>, vector<16x32xf32> -> vector<16x32xf32>
    %67 = vector.broadcast %65 : vector<1x32xf32> to vector<16x32xf32>
    %68 = arith.addf %66, %67 : vector<16x32xf32>
    %69 = arith.addf %68, %56 : vector<16x32xf32>
    %cst_30 = arith.constant dense<0.000000e+00> : vector<16xf32>
    %70 = vector.multi_reduction <add>, %69, %cst_30 [1] : vector<16x32xf32> to vector<16xf32>
    %71 = vector.shape_cast %70 : vector<16xf32> to vector<16x1xf32>
    %cst_31 = arith.constant 3.200000e+01 : f32
    %72 = vector.broadcast %cst_31 : f32 to vector<16x1xf32>
    %73 = arith.divf %71, %72 : vector<16x1xf32>
    %74 = vector.broadcast %73 : vector<16x1xf32> to vector<16x32xf32>
    %75 = arith.subf %69, %74 : vector<16x32xf32>
    %76 = arith.mulf %75, %75 : vector<16x32xf32>
    %cst_32 = arith.constant dense<0.000000e+00> : vector<16xf32>
    %77 = vector.multi_reduction <add>, %76, %cst_32 [1] : vector<16x32xf32> to vector<16xf32>
    %78 = vector.shape_cast %77 : vector<16xf32> to vector<16x1xf32>
    %cst_33 = arith.constant 3.200000e+01 : f32
    %79 = vector.broadcast %cst_33 : f32 to vector<16x1xf32>
    %80 = arith.divf %78, %79 : vector<16x1xf32>
    %cst_34 = arith.constant 9.99999974E-6 : f32
    %81 = vector.broadcast %cst_34 : f32 to vector<16x1xf32>
    %82 = arith.addf %80, %81 : vector<16x1xf32>
    %83 = math.rsqrt %82 : vector<16x1xf32>
    %84 = vector.broadcast %83 : vector<16x1xf32> to vector<16x32xf32>
    %85 = arith.mulf %75, %84 : vector<16x32xf32>
    %86 = arith.mulf %85, %34 : vector<16x32xf32>
    %87 = arith.addf %86, %37 : vector<16x32xf32>
    %c0_35 = arith.constant 0 : index
    %c0_36 = arith.constant 0 : index
    %88 = vector.load %arg2[%c0_35, %c0_36] : memref<16x32xf32, #tpu.memory_space<vmem>>, vector<16x32xf32>
    tpu.vector_store %arg2[%c0_35, %c0_36], %87 {strides = array<i32>} : memref<16x32xf32, #tpu.memory_space<vmem>>, vector<16x32xf32>,
    return
  }
}

</mosaic_0001>

<bundles_post_ra>
// kernel: transformer_block.1
= control target key start
LH: loop header
LB: loop body
LE: loop exit
PB: predicated region body
PF: predicated region fallthrough
CT: control target
= control target key end

     0   :  { %7 = vsyncpa [#allocation3], 0  ;;  %s7991_s0 = inlined_call_operand.vmem [shape: f32[16,128], index: 0, kind: input, shape index: {}]   ;;  %s7992_s1 = inlined_call_operand.hbm [shape: f32[472,128], index: 1, kind: input, shape index: {}]   ;;  %s7993_s2 = inlined_call_operand.hbm [shape: f32[16,32], index: 2, kind: output, shape index: {}]  }
   0x1   :  { %8 = vsyncpa [#allocation4], 0  ;;  %s7256_s9 = smov [#allocation2]   ;;  %s7208_s13 = scalar_lea.hbm %s7992_s1, 7552 }
   0x2   :  { %s16_s10 = sshll.u32 %s7256_s9, 4  ;;  %p7209_p0 = scmp.ne.s32.totalorder %s7992_s1, %s7208_s13  ;;  %s17_s10 = int_to_ptr.vmem [resolvable:$true] %s16_s10 }
   0x3   :  { %p7212_p1 = scmp.lt.u32.totalorder %s7208_s13, %s7992_s1 }
   0x5   :  { %p7214_p2 = pnand %p7212_p1, %p7209_p0 }
   0x7   :  { %7217 = shalt.err (!%p7214_p2)
}
   0x8   :  { %s7218_s18 = scalar_lea.vmem %s17_s10, 7552  ;;  %p7223_p4 = scmp.lt.s32.totalorder %s17_s10, %s17_s10 }
   0x9   :  { %p7219_p3 = scmp.ne.s32.totalorder %s17_s10, %s7218_s18  ;;  %p7224_p5 = scmp.lt.s32.totalorder %s7218_s18, %s7218_s18 }
   0xb   :  { %p7225_p6 = por %p7224_p5, %p7223_p4 }
   0xd   :  { %p7226_p7 = pnand %p7225_p6, %p7219_p3 }
   0xf   :  { %7229 = shalt.err (!%p7226_p7)
}
  0x10   :  { %s7257_s19 = smov 128   ;;  %s7258_s20 = smov 8  }
  0x11   :  { %22 = dma.hbm_to_vmem [thread:$0]  %s7992_s1, 7552, %s17_s10, [#allocation3], %s7257_s19, %s7257_s19, %s7258_s20  }
  0x12   :  { %7252 = dma.done.wait [#allocation3], 7552  }
  0x13   :  { %7253 = vsyncadd [#allocation3], 4294959744  ;;  %v28_v0 = vld [vmem:[#allocation2] sm:$0xff]  ;;  %v29_v1 = vld [vmem:[#allocation2 + $0x8] sm:$0xff]  ;;  %vm40_vm0 = vcmask 785408   ;;  %vm703_vm1 = vcmask 130048  }
  0x14   :  { %v30_v2 = vld [vmem:[#allocation2 + $0x10] sm:$0xff]  ;;  %v48_v3 = vand.u32 4294901760, %v28_v0  ;;  %v51_v4 = vand.u32 4294901760, %v29_v1  ;;  %v31_v5 = vld [vmem:[#allocation2 + $0x18] sm:$0xff]  ;;  %v32_v7 = vld [vmem:[#allocation2 + $0x20] sm:$0xff]  ;;  %s7259_s26 = smov 96  }
  0x15   :  { %v54_v6 = vand.u32 4294901760, %v30_v2  ;;  %v33_v8 = vld [vmem:[#allocation2 + $0x28] sm:$0xff]  ;;  %v57_v9 = vand.u32 4294901760, %v31_v5  ;;  %v60_v10 = vand.u32 4294901760, %v32_v7  ;;  %v34_v16 = vld [vmem:[#allocation2 + $0x30] sm:$0xff]  ;;  %v35_v17 = vld [vmem:[#allocation2 + $0x38] sm:$0xff] }
  0x16   :  { %v63_v11 = vand.u32 4294901760, %v33_v8  ;;  %v7292_v12 = vpack.c.bf16 %v51_v4, %v48_v3  ;;  %v7294_v13 = vsub.f32 %v28_v0, %v48_v3  ;;  %v7296_v14 = vsub.f32 %v29_v1, %v51_v4  ;;  %v36_v37 = vld [vmem:[#allocation2 + $0x40] sm:$0xff]  ;;  %v37_v38 = vld [vmem:[#allocation2 + $0x48] sm:$0xff]  ;;  %v38_v43 = vld [vmem:[#allocation2 + $0x50] sm:$0xff]  ;;  %s7260_s29 = smov 32  }
  0x17   :  { %v7298_v15 = vsub.f32 %v30_v2, %v54_v6  ;;  %v7300_v18 = vpack.c.bf16 %v57_v9, %v54_v6  ;;  %v7302_v19 = vsub.f32 %v31_v5, %v57_v9  ;;  %v7304_v20 = vsub.f32 %v32_v7, %v60_v10  ;;  %v39_v52 = vld [vmem:[#allocation2 + $0x58] sm:$0xff]  ;;  %v26_v57 = vld [vmem:[%s7991_s0] sm:$0xff]  ;;  %v27_v1 = vld [vmem:[%s7991_s0 + $0x8] sm:$0xff] }
  0x18   :  { %v147_v21 = vand.u32 4294901760, %v7294_v13  ;;  %v154_v22 = vand.u32 4294901760, %v7296_v14  ;;  %v7309_v24 = vsub.f32 %v33_v8, %v63_v11  ;;  %6419 = vmatprep.subr.bf16.mxu1 %v7292_v12  ;;  %v66_v27 = vand.u32 4294901760, %v34_v16 }
  0x19   :  { %v161_v23 = vand.u32 4294901760, %v7298_v15  ;;  %v168_v25 = vand.u32 4294901760, %v7302_v19  ;;  %v175_v26 = vand.u32 4294901760, %v7304_v20  ;;  %v69_v28 = vand.u32 4294901760, %v35_v17  ;;  %6421 = vmatpush3.bf16.msra.mxu1 %v7292_v12 }
  0x1a   :  { %v148_v29 = vsub.f32 %v7294_v13, %v147_v21  ;;  %v155_v30 = vsub.f32 %v7296_v14, %v154_v22  ;;  %v182_v32 = vand.u32 4294901760, %v7309_v24  ;;  %6423 = vmatprep.subr.bf16.mxu1 %v7300_v18  ;;  %v7329_v34 = vpack.c.bf16 %v63_v11, %v60_v10 }
  0x1b   :  { %v162_v31 = vsub.f32 %v7298_v15, %v161_v23  ;;  %v169_v33 = vsub.f32 %v7302_v19, %v168_v25  ;;  %v176_v35 = vsub.f32 %v7304_v20, %v175_v26  ;;  %v7334_v36 = vsub.f32 %v34_v16, %v66_v27 }
  0x1c   :  { %v149_v39 = vand.u32 4294901760, %v148_v29  ;;  %v156_v40 = vand.u32 4294901760, %v155_v30  ;;  %v183_v42 = vsub.f32 %v7309_v24, %v182_v32  ;;  %v7340_v47 = vsub.f32 %v35_v17, %v69_v28 }
  0x1d   :  { %v163_v41 = vand.u32 4294901760, %v162_v31  ;;  %v170_v44 = vand.u32 4294901760, %v169_v33  ;;  %v177_v45 = vand.u32 4294901760, %v176_v35  ;;  %v189_v46 = vand.u32 4294901760, %v7334_v36  ;;  %6425 = vmatpush3.bf16.msra.mxu1 %v7300_v18 }
  0x1e   :  { %v6442_v48 = vpack.c.bf16 %v156_v40, %v149_v39  ;;  %v184_v49 = vand.u32 4294901760, %v183_v42  ;;  %v72_v50 = vand.u32 4294901760, %v36_v37  ;;  %v75_v51 = vand.u32 4294901760, %v37_v38  ;;  %6427 = vmatprep.subr.bf16.mxu1 %v7329_v34 }
  0x1f   :  { %v6446_v53 = vpack.c.bf16 %v170_v44, %v163_v41  ;;  %v190_v54 = vsub.f32 %v7334_v36, %v189_v46  ;;  %v196_v55 = vand.u32 4294901760, %v7340_v47  ;;  %v78_v56 = vand.u32 4294901760, %v38_v43 }
  0x20   :  { %6443 = vmatprep.subr.bf16.mxu0 %v6442_v48  ;;  %v7351_v58 = vpack.c.bf16 %v69_v28, %v66_v27  ;;  %v7353_v59 = vsub.f32 %v36_v37, %v72_v50  ;;  %v7355_v60 = vsub.f32 %v37_v38, %v75_v51  ;;  %v6450_v61 = vpack.c.bf16 %v184_v49, %v177_v45 }
  0x21   :  { %6445 = vmatpush3.bf16.msra.mxu0 %v6442_v48  ;;  %v197_v62 = vsub.f32 %v7340_v47, %v196_v55  ;;  %v81_v63 = vand.u32 4294901760, %v39_v52  ;;  %v7358_v0 = vsub.f32 %v38_v43, %v78_v56  ;;  %6429 = vmatpush3.bf16.msra.mxu1 %v7329_v34  ;;  %v191_v2 = vand.u32 4294901760, %v190_v54 }
  0x22   :  { %6447 = vmatprep.subr.bf16.mxu0 %v6446_v53  ;;  %v203_v3 = vand.u32 4294901760, %v7353_v59  ;;  %v210_v4 = vand.u32 4294901760, %v7355_v60  ;;  %v42_v5 = vsel %vm40_vm0, %v26_v57, 0  ;;  %6431 = vmatprep.subr.bf16.mxu1 %v7351_v58  ;;  %v45_v16 = vsel %vm40_vm0, %v27_v1, 0  ;;  %v683_v1 = vld [vmem:[#allocation2 + $0x80] sm:$0xff] }
  0x23   :  { %v198_v6 = vand.u32 4294901760, %v197_v62  ;;  %v217_v7 = vand.u32 4294901760, %v7358_v0  ;;  %v7369_v8 = vsub.f32 %v39_v52, %v81_v63  ;;  %v7373_v11 = vand.u32 4294901760, %v42_v5  ;;  %v682_v62 = vld [vmem:[#allocation2 + $0x78] sm:$0xff] }
  0x24   :  { %v204_v9 = vsub.f32 %v7353_v59, %v203_v3  ;;  %v211_v10 = vsub.f32 %v7355_v60, %v210_v4  ;;  %v7376_v17 = vpack.c.bf16 %v75_v51, %v72_v50  ;;  %v7382_v33 = vand.u32 4294901760, %v45_v16 }
  0x25   :  { %6449 = vmatpush3.bf16.msra.mxu0 %v6446_v53  ;;  %v218_v27 = vsub.f32 %v7358_v0, %v217_v7  ;;  %v224_v28 = vand.u32 4294901760, %v7369_v8  ;;  %6433 = vmatpush3.bf16.msra.mxu1 %v7351_v58  ;;  %v6454_v29 = vpack.c.bf16 %v198_v6, %v191_v2  ;;  %v7384_v35 = vpack.c.bf16 %v81_v63, %v78_v56 }
  0x26   :  { %6451 = vmatprep.subr.bf16.mxu0 %v6450_v61  ;;  %v205_v30 = vand.u32 4294901760, %v204_v9  ;;  %v212_v31 = vand.u32 4294901760, %v211_v10  ;;  %5623 = vmatprep.mubr.f32.mxu0 %v7373_v11  ;;  %v125_v40 = vsub.f32 %v42_v5, %v7373_v11  ;;  %v135_v41 = vsub.f32 %v45_v16, %v7382_v33  ;;  %v684_v5 = vld [vmem:[#allocation2 + $0x88] sm:$0xff] }
  0x27   :  { %v225_v37 = vsub.f32 %v7369_v8, %v224_v28  ;;  %6435 = vmatprep.subr.bf16.mxu1 %v7376_v17  ;;  %v219_v39 = vand.u32 4294901760, %v218_v27  ;;  %v6514_v43 = vpack.c.bf16 %v154_v22, %v147_v21  ;;  %v6518_v44 = vpack.c.bf16 %v168_v25, %v161_v23 }
  0x28   :  { %v6458_v38 = vpack.c.bf16 %v212_v31, %v205_v30  ;;  %v6522_v45 = vpack.c.bf16 %v182_v32, %v175_v26  ;;  %v126_v48 = vand.u32 4294901760, %v125_v40  ;;  %v136_v49 = vand.u32 4294901760, %v135_v41 }
  0x29   :  { %6453 = vmatpush3.bf16.msra.mxu0 %v6450_v61  ;;  %v226_v42 = vand.u32 4294901760, %v225_v37  ;;  %6437 = vmatpush3.bf16.msra.mxu1 %v7376_v17  ;;  %v6526_v50 = vpack.c.bf16 %v196_v55, %v189_v46  ;;  %v6530_v51 = vpack.c.bf16 %v210_v4, %v203_v3  ;;  %v6534_v21 = vpack.c.bf16 %v224_v28, %v217_v7 }
  0x2a   :  { %6455 = vmatprep.subr.bf16.mxu0 %v6454_v29  ;;  %6439 = vmatprep.subr.bf16.mxu1 %v7384_v35  ;;  %v127_v22 = vsub.f32 %v125_v40, %v126_v48  ;;  %v137_v52 = vsub.f32 %v135_v41, %v136_v49  ;;  %v6466_v32 = vpack.c.bf16 %v7296_v14, %v7294_v13  ;;  %v714_v2 = vsel %vm703_vm1, %v682_v62, 0 }
  0x2b   :  { %v6462_v23 = vpack.c.bf16 %v226_v42, %v219_v39  ;;  %v6470_v46 = vpack.c.bf16 %v7302_v19, %v7298_v15  ;;  %v6474_v53 = vpack.c.bf16 %v7309_v24, %v7304_v20  ;;  %v6478_v54 = vpack.c.bf16 %v7340_v47, %v7334_v36 }
  0x2c   :  { %v128_v25 = vand.u32 4294901760, %v127_v22  ;;  %v138_v26 = vand.u32 4294901760, %v137_v52  ;;  %v6482_v13 = vpack.c.bf16 %v7355_v60, %v7353_v59  ;;  %v6486_v14 = vpack.c.bf16 %v7369_v8, %v7358_v0  ;;  %v680_v59 = vld [vmem:[#allocation2 + $0x68] sm:$0xff]  ;;  %v681_v60 = vld [vmem:[#allocation2 + $0x70] sm:$0xff] }
  0x2d   :  { %6457 = vmatpush3.bf16.msra.mxu0 %v6454_v29  ;;  %6441 = vmatpush3.bf16.msra.mxu1 %v7384_v35  ;;  %v708_v61 = vsel %vm703_vm1, %v680_v59, 0  ;;  %v711_v63 = vsel %vm703_vm1, %v681_v60, 0  ;;  %v717_v4 = vsel %vm703_vm1, %v683_v1, 0  ;;  %v7477_v7 = vand.u32 4294901760, %v714_v2  ;;  %v685_v8 = vld [vmem:[#allocation2 + $0x90] sm:$0xff] }
  0x2e   :  { %6459 = vmatprep.subr.bf16.mxu0 %v6458_v38  ;;  %5596 = vmatprep.mubr.f32.mxu1 %v128_v25  ;;  %v7468_v0 = vand.u32 4294901760, %v708_v61  ;;  %v7471_v3 = vand.u32 4294901760, %v711_v63  ;;  %v7482_v10 = vand.u32 4294901760, %v717_v4  ;;  %v723_v16 = vsel %vm703_vm1, %v685_v8, 0 }
  0x2f   :  { %v7488_v29 = vsub.f32 %v714_v2, %v7477_v7  ;;  %v7496_v37 = vand.u32 4294901760, %v723_v16  ;;  %vm1498_vm2 = vcmask 261120   ;;  %vm2107_vm3 = vcmask 523264  }
  0x30   :  { %5597 = vmatmul.mubr.f32.vlgmr.msra.gmra.mrb[0].mxu1 %v138_v26  ;;  %v7475_v6 = vsub.f32 %v708_v61, %v7468_v0  ;;  %v7480_v9 = vsub.f32 %v711_v63, %v7471_v3 }
  0x31   :  { %6461 = vmatpush3.bf16.msra.mxu0 %v6458_v38  ;;  %v827_v42 = vand.u32 4294901760, %v7488_v29 }
  0x32   :  { %6463 = vmatprep.subr.bf16.mxu0 %v6462_v23  ;;  %v807_v28 = vand.u32 4294901760, %v7475_v6 }
  0x35   :  { %6465 = vmatpush3.bf16.msra.mxu0 %v6462_v23  ;;  %v828_v23 = vsub.f32 %v7488_v29, %v827_v42 }
  0x36   :  { %6467 = vmatprep.subr.bf16.mxu0 %v6466_v32 }
  0x38   :  { %5624 = vmatmul.mubr.f32.vlgmr.msra.gmra.mrb[0].mxu0 %v7382_v33 }
  0x39   :  { %6469 = vmatpush3.bf16.msra.mxu0 %v6466_v32  ;;  %5650 = vmatprep.mubr.f32.mxu0 %v125_v40 }
  0x3a   :  { %6471 = vmatprep.subr.bf16.mxu0 %v6470_v46 }
  0x3d   :  { %6473 = vmatpush3.bf16.msra.mxu0 %v6470_v46 }
  0x3e   :  { %6475 = vmatprep.subr.bf16.mxu0 %v6474_v53 }
  0x41   :  { %6477 = vmatpush3.bf16.msra.mxu0 %v6474_v53 }
  0x42   :  { %6479 = vmatprep.subr.bf16.mxu0 %v6478_v54 }
  0x45   :  { %6481 = vmatpush3.bf16.msra.mxu0 %v6478_v54 }
  0x46   :  { %6483 = vmatprep.subr.bf16.mxu0 %v6482_v13 }
  0x49   :  { %6485 = vmatpush3.bf16.msra.mxu0 %v6482_v13 }
  0x4a   :  { %6487 = vmatprep.subr.bf16.mxu0 %v6486_v14 }
  0x4d   :  { %6489 = vmatpush3.bf16.msra.mxu0 %v6486_v14 }
  0x4e   :  { %6491 = vmatprep.subr.bf16.mxu0 %v7292_v12 }
  0x50   :  { %5651 = vmatmul.mubr.f32.vlgmr.msra.gmra.mrb[0].mxu0 %v135_v41  ;;  %v808_v41 = vsub.f32 %v7475_v6, %v807_v28 }
  0x51   :  { %6493 = vmatpush3.bf16.msra.mxu0 %v7292_v12  ;;  %5677 = vmatprep.mubr.f32.mxu0 %v126_v48 }
  0x52   :  { %6495 = vmatprep.subr.bf16.mxu0 %v7300_v18  ;;  %v809_v52 = vand.u32 4294901760, %v808_v41 }
  0x55   :  { %6497 = vmatpush3.bf16.msra.mxu0 %v7300_v18 }
  0x56   :  { %6499 = vmatprep.subr.bf16.mxu0 %v7329_v34 }
  0x59   :  { %6501 = vmatpush3.bf16.msra.mxu0 %v7329_v34 }
  0x5a   :  { %6503 = vmatprep.subr.bf16.mxu0 %v7351_v58 }
  0x5d   :  { %6505 = vmatpush3.bf16.msra.mxu0 %v7351_v58 }
  0x5e   :  { %6507 = vmatprep.subr.bf16.mxu0 %v7376_v17 }
  0x61   :  { %6509 = vmatpush3.bf16.msra.mxu0 %v7376_v17 }
  0x62   :  { %6511 = vmatprep.subr.bf16.mxu0 %v7384_v35 }
  0x65   :  { %6513 = vmatpush3.bf16.msra.mxu0 %v7384_v35 }
  0x66   :  { %6515 = vmatprep.subr.bf16.mxu0 %v6514_v43 }
  0x68   :  { %5678 = vmatmul.mubr.f32.vlgmr.msra.gmra.mrb[0].mxu0 %v136_v49 }
  0x69   :  { %6517 = vmatpush3.bf16.msra.mxu0 %v6514_v43  ;;  %5704 = vmatprep.mubr.f32.mxu0 %v7373_v11 }
  0x6a   :  { %6519 = vmatprep.subr.bf16.mxu0 %v6518_v44 }
  0x6d   :  { %6521 = vmatpush3.bf16.msra.mxu0 %v6518_v44 }
  0x6e   :  { %6523 = vmatprep.subr.bf16.mxu0 %v6522_v45 }
  0x71   :  { %6525 = vmatpush3.bf16.msra.mxu0 %v6522_v45 }
  0x72   :  { %6527 = vmatprep.subr.bf16.mxu0 %v6526_v50 }
  0x75   :  { %6529 = vmatpush3.bf16.msra.mxu0 %v6526_v50 }
  0x76   :  { %6531 = vmatprep.subr.bf16.mxu0 %v6530_v51 }
  0x79   :  { %6533 = vmatpush3.bf16.msra.mxu0 %v6530_v51  ;;  %v7513_v51 = vsub.f32 %v723_v16, %v7496_v37 }
  0x7a   :  { %6535 = vmatprep.subr.bf16.mxu0 %v6534_v21 }
  0x7b   :  { %v857_v13 = vand.u32 4294901760, %v7513_v51 }
  0x7d   :  { %6537 = vmatpush3.bf16.msra.mxu0 %v6534_v21 }
  0x7e   :  { %6539 = vmatprep.subr.bf16.mxu0 %v7292_v12 }
  0x80   :  { %5705 = vmatmul.mubr.f32.vlgmr.msra.gmra.mrb[0].mxu0 %v7382_v33 }
  0x81   :  { %6541 = vmatpush3.bf16.msra.mxu0 %v7292_v12  ;;  %5731 = vmatprep.mubr.f32.mxu0 %v7373_v11  ;;  %v720_v11 = vsel %vm703_vm1, %v684_v5, 0 }
  0x82   :  { %6543 = vmatprep.subr.bf16.mxu0 %v7300_v18  ;;  %v7490_v31 = vand.u32 4294901760, %v720_v11 }
  0x84   :  { %v7504_v45 = vsub.f32 %v720_v11, %v7490_v31  ;;  %v689_v11 = vld [vmem:[#allocation2 + $0xb0] sm:$0xff] }
  0x85   :  { %6545 = vmatpush3.bf16.msra.mxu0 %v7300_v18  ;;  %v679_v18 = vld [vmem:[#allocation2 + $0x60] sm:$0xff] }
  0x86   :  { %6547 = vmatprep.subr.bf16.mxu0 %v7329_v34  ;;  %v705_v19 = vsel %vm703_vm1, %v679_v18, 0  ;;  %v847_v32 = vand.u32 4294901760, %v7504_v45 }
  0x87   :  { %v7449_v20 = vand.u32 4294901760, %v705_v19 }
  0x89   :  { %6549 = vmatpush3.bf16.msra.mxu0 %v7329_v34  ;;  %v7452_v24 = vsub.f32 %v705_v19, %v7449_v20  ;;  %v848_v19 = vsub.f32 %v7504_v45, %v847_v32 }
  0x8a   :  { %6551 = vmatprep.subr.bf16.mxu0 %v7351_v58 }
  0x8b   :  { %v797_v34 = vand.u32 4294901760, %v7452_v24  ;;  %v849_v60 = vand.u32 4294901760, %v848_v19 }
  0x8d   :  { %6553 = vmatpush3.bf16.msra.mxu0 %v7351_v58  ;;  %v798_v36 = vsub.f32 %v7452_v24, %v797_v34 }
  0x8e   :  { %6555 = vmatprep.subr.bf16.mxu0 %v7376_v17 }
  0x8f   :  { %v799_v55 = vand.u32 4294901760, %v798_v36 }
  0x91   :  { %6557 = vmatpush3.bf16.msra.mxu0 %v7376_v17  ;;  %5738 = vmatprep.mubr.f32.mxu1 %v799_v55  ;;  %v686_v17 = vld [vmem:[#allocation2 + $0x98] sm:$0xff]  ;;  %v858_v55 = vsub.f32 %v7513_v51, %v857_v13 }
  0x92   :  { %6559 = vmatprep.subr.bf16.mxu0 %v7384_v35  ;;  %v726_v38 = vsel %vm703_vm1, %v686_v17, 0 }
  0x93   :  { %v7506_v48 = vand.u32 4294901760, %v726_v38  ;;  %v859_v62 = vand.u32 4294901760, %v858_v55 }
  0x95   :  { %6561 = vmatpush3.bf16.msra.mxu0 %v7384_v35  ;;  %v7494_v35 = vsub.f32 %v717_v4, %v7482_v10  ;;  %v866_v46 = vsub.f32 %v726_v38, %v7506_v48  ;;  %v691_v38 = vld [vmem:[#allocation2 + $0xc0] sm:$0xff] }
  0x97   :  { %v837_v50 = vand.u32 4294901760, %v7494_v35  ;;  %v867_v36 = vand.u32 4294901760, %v866_v46 }
  0x98   :  { %5732 = vmatmul.mubr.f32.vlgmr.msra.gmra.mrb[0].mxu0 %v7382_v33  ;;  %v817_v33 = vand.u32 4294901760, %v7480_v9 }
  0x99   :  { %v838_v54 = vsub.f32 %v7494_v35, %v837_v50  ;;  %v868_v61 = vsub.f32 %v866_v46, %v867_v36 }
  0x9a   :  { %v818_v49 = vsub.f32 %v7480_v9, %v817_v33 }
  0x9b   :  { %v869_v63 = vand.u32 4294901760, %v868_v61 }
  0x9c   :  { %v819_v53 = vand.u32 4294901760, %v818_v49 }
 0x103   :  { %v5598_v12 = vpop.f32.mrb[0].mxu1 }
 0x104   :  { %v130_v15 = vpop.f32.mrb[1].mxu1 }
 0x16b   :  { %v5733_v47 = vpop.f32.mrb[0].mxu0 }
 0x16c   :  { %v7458_v56 = vadd.f32 %v5733_v47, %v5598_v12  ;;  %v669_v57 = vpop.f32.mrb[1].mxu0  ;;  %v829_v12 = vand.u32 4294901760, %v828_v23  ;;  %v839_v47 = vand.u32 4294901760, %v838_v54  ;;  %v693_v23 = vld [vmem:[#allocation2 + $0xd0] sm:$0xff] }
 0x16d   :  { %v7460_v58 = vadd.f32 %v669_v57, %v130_v15 }
 0x16f   :  { %697 = vrot.lane.b32.xlu0 %v7460_v58, %s7259_s26 }
 0x173   :  { %699 = vrot.lane.b32.xlu0 %v7458_v56, %s7259_s26 }
 0x1e1   :  { %v698_v27 = vpop.permute.xlu0 %697 }
 0x1e2   :  { %v729_v30 = vand.u32 4294901760, %v698_v27 }
 0x1e4   :  { %v877_v39 = vsub.f32 %v698_v27, %v729_v30 }
 0x1e5   :  { %v700_v40 = vpop.permute.xlu0 %699 }
 0x1e6   :  { %v878_v43 = vand.u32 4294901760, %v877_v39  ;;  %v732_v44 = vand.u32 4294901760, %v700_v40 }
 0x1e8   :  { %v7515_v21 = vpack.c.bf16 %v732_v44, %v729_v30  ;;  %v884_v22 = vsub.f32 %v700_v40, %v732_v44  ;;  %v879_v25 = vsub.f32 %v877_v39, %v878_v43 }
 0x1ea   :  { %v885_v26 = vand.u32 4294901760, %v884_v22  ;;  %6563 = vmatprep.subr.bf16.mxu1 %v7515_v21  ;;  %v880_v15 = vand.u32 4294901760, %v879_v25  ;;  %v6570_v59 = vpack.c.bf16 %v884_v22, %v877_v39 }
 0x1eb   :  { %6565 = vmatpush3.bf16.msra.mxu1 %v7515_v21 }
 0x1ec   :  { %v886_v14 = vsub.f32 %v884_v22, %v885_v26  ;;  %v6578_v1 = vpack.c.bf16 %v885_v26, %v878_v43 }
 0x1ee   :  { %5739 = vmatmul.mubr.f32.vlgmr.msra.gmra.mrb[2].mxu1 %v809_v52  ;;  %v887_v18 = vand.u32 4294901760, %v886_v14 }
 0x1ef   :  { %5741 = vmatprep.mubr.f32.mxu1 %v819_v53 }
 0x1f0   :  { %v6566_v57 = vpack.c.bf16 %v887_v18, %v880_v15 }
 0x1f2   :  { %5742 = vmatmul.mubr.f32.gmra.mrb[4].mxu1 %v829_v12  ;;  %6567 = vmatprep.subr.bf16.mxu1 %v6566_v57 }
 0x1f3   :  { %6569 = vmatpush3.bf16.msra.mxu1 %v6566_v57  ;;  %5744 = vmatprep.mubr.f32.mxu1 %v839_v47 }
 0x1f4   :  { %6571 = vmatprep.subr.bf16.mxu1 %v6570_v59 }
 0x1f6   :  { %5745 = vmatmul.mubr.f32.gmra.mrb[6].mxu1 %v849_v60 }
 0x1f7   :  { %5747 = vmatprep.mubr.f32.mxu1 %v859_v62 }
 0x1fa   :  { %5748 = vmatmul.mubr.f32.gmra.mrb[8].mxu1 %v869_v63 }
 0x1fb   :  { %5754 = vmatprep.mubr.f32.mxu1 %v7449_v20 }
 0x1fe   :  { %5755 = vmatmul.mubr.f32.vlgmr.msra.gmra.mrb[2].mxu1 %v7468_v0 }
 0x1ff   :  { %6573 = vmatpush3.bf16.msra.mxu1 %v6570_v59  ;;  %5757 = vmatprep.mubr.f32.mxu1 %v7471_v3 }
 0x200   :  { %6575 = vmatprep.subr.bf16.mxu1 %v7515_v21 }
 0x202   :  { %5758 = vmatmul.mubr.f32.gmra.mrb[4].mxu1 %v7477_v7 }
 0x203   :  { %5760 = vmatprep.mubr.f32.mxu1 %v7482_v10 }
 0x206   :  { %5761 = vmatmul.mubr.f32.gmra.mrb[6].mxu1 %v7490_v31 }
 0x207   :  { %5763 = vmatprep.mubr.f32.mxu1 %v7496_v37 }
 0x20a   :  { %5764 = vmatmul.mubr.f32.gmra.mrb[8].mxu1 %v7506_v48 }
 0x20b   :  { %5770 = vmatprep.mubr.f32.mxu1 %v7452_v24  ;;  %v1499_v24 = vsel %vm1498_vm2, %v7460_v58, 0 }
 0x20e   :  { %5771 = vmatmul.mubr.f32.vlgmr.msra.gmra.mrb[2].mxu1 %v7475_v6 }
 0x20f   :  { %6577 = vmatpush3.bf16.msra.mxu1 %v7515_v21  ;;  %5773 = vmatprep.mubr.f32.mxu1 %v7480_v9  ;;  %v690_v9 = vld [vmem:[#allocation2 + $0xb8] sm:$0xff] }
 0x210   :  { %6579 = vmatprep.subr.bf16.mxu1 %v6578_v1 }
 0x212   :  { %5774 = vmatmul.mubr.f32.gmra.mrb[4].mxu1 %v7488_v29 }
 0x213   :  { %5776 = vmatprep.mubr.f32.mxu1 %v7494_v35 }
 0x216   :  { %5777 = vmatmul.mubr.f32.gmra.mrb[6].mxu1 %v7504_v45 }
 0x217   :  { %5779 = vmatprep.mubr.f32.mxu1 %v7513_v51  ;;  %v694_v51 = vld [vmem:[#allocation2 + $0xd8] sm:$0xff] }
 0x21a   :  { %5780 = vmatmul.mubr.f32.gmra.mrb[8].mxu1 %v866_v46 }
 0x21b   :  { %5786 = vmatprep.mubr.f32.mxu1 %v797_v34  ;;  %v7568_v34 = vand.u32 4294901760, %v1499_v24 }
 0x21d   :  { %v7573_v2 = vsub.f32 %v1499_v24, %v7568_v34 }
 0x21e   :  { %5787 = vmatmul.mubr.f32.vlgmr.msra.gmra.mrb[2].mxu1 %v807_v28 }
 0x21f   :  { %6581 = vmatpush3.bf16.msra.mxu1 %v6578_v1  ;;  %5789 = vmatprep.mubr.f32.mxu1 %v817_v33  ;;  %v1602_v4 = vand.u32 4294901760, %v7573_v2  ;;  %v692_v33 = vld [vmem:[#allocation2 + $0xc8] sm:$0xff] }
 0x220   :  { %6583 = vmatprep.subr.bf16.mxu1 %v7515_v21 }
 0x221   :  { %v1603_v58 = vsub.f32 %v7573_v2, %v1602_v4 }
 0x222   :  { %5790 = vmatmul.mubr.f32.gmra.mrb[4].mxu1 %v827_v42 }
 0x223   :  { %5792 = vmatprep.mubr.f32.mxu1 %v837_v50 }
 0x226   :  { %5793 = vmatmul.mubr.f32.gmra.mrb[6].mxu1 %v847_v32 }
 0x227   :  { %5795 = vmatprep.mubr.f32.mxu1 %v857_v13 }
 0x22a   :  { %5796 = vmatmul.mubr.f32.gmra.mrb[8].mxu1 %v867_v36 }
 0x22b   :  { %5802 = vmatprep.mubr.f32.mxu1 %v7449_v20 }
 0x22e   :  { %5803 = vmatmul.mubr.f32.vlgmr.msra.gmra.mrb[2].mxu1 %v7468_v0 }
 0x22f   :  { %6585 = vmatpush3.bf16.msra.mxu1 %v7515_v21  ;;  %5805 = vmatprep.mubr.f32.mxu1 %v7471_v3 }
 0x232   :  { %5806 = vmatmul.mubr.f32.gmra.mrb[4].mxu1 %v7477_v7 }
 0x233   :  { %5808 = vmatprep.mubr.f32.mxu1 %v7482_v10 }
 0x236   :  { %5809 = vmatmul.mubr.f32.gmra.mrb[6].mxu1 %v7490_v31 }
 0x237   :  { %5811 = vmatprep.mubr.f32.mxu1 %v7496_v37 }
 0x23a   :  { %5812 = vmatmul.mubr.f32.gmra.mrb[8].mxu1 %v7506_v48 }
 0x23b   :  { %5818 = vmatprep.mubr.f32.mxu1 %v7449_v20  ;;  %v1604_v20 = vand.u32 4294901760, %v1603_v58 }
 0x23e   :  { %5819 = vmatmul.mubr.f32.vlgmr.msra.gmra.mrb[2].mxu1 %v7468_v0  ;;  %v688_v0 = vld [vmem:[#allocation2 + $0xa8] sm:$0xff] }
 0x23f   :  { %5821 = vmatprep.mubr.f32.mxu1 %v7471_v3  ;;  %v687_v3 = vld [vmem:[#allocation2 + $0xa0] sm:$0xff] }
 0x242   :  { %5822 = vmatmul.mubr.f32.gmra.mrb[4].mxu1 %v7477_v7 }
 0x243   :  { %5824 = vmatprep.mubr.f32.mxu1 %v7482_v10 }
 0x246   :  { %5825 = vmatmul.mubr.f32.gmra.mrb[6].mxu1 %v7490_v31 }
 0x247   :  { %5827 = vmatprep.mubr.f32.mxu1 %v7496_v37 }
 0x24a   :  { %5828 = vmatmul.mubr.f32.gmra.mrb[8].mxu1 %v7506_v48 }
 0x24b   :  { %5846 = vmatprep.mubr.f32.mxu1 %v1604_v20 }
 0x311   :  { %v5820_v5 = vpop.f32.mrb[2].mxu1 }
 0x312   :  { %v7586_v6 = vmul.f32 %v5820_v5, %v688_v0  ;;  %v1442_v7 = vpop.f32.mrb[3].mxu1 }
 0x313   :  { %v1488_v8 = vmul.f32 %v1442_v7, %v687_v3 }
 0x314   :  { %v1507_v10 = vsel %vm1498_vm2, %v7586_v6, 0 }
 0x315   :  { %v1531_v16 = vand.u32 4294901760, %v1507_v10  ;;  %v1504_v17 = vsel %vm1498_vm2, %v1488_v8, 0  ;;  %2714 = vrot.lane.b32.xlu0 %v1488_v8, %s7259_s26  ;;  %v5823_v27 = vpop.f32.mrb[4].mxu1  ;;  %v1501_v8 = vsel %vm1498_vm2, %v7458_v56, 0 }
 0x316   :  { %v1528_v28 = vand.u32 4294901760, %v1504_v17  ;;  %v1491_v29 = vmul.f32 %v5823_v27, %v690_v9  ;;  %v1454_v30 = vpop.f32.mrb[5].mxu1 }
 0x317   :  { %v1490_v31 = vmul.f32 %v1454_v30, %v689_v11  ;;  %v7595_v39 = vsub.f32 %v1507_v10, %v1531_v16 }
 0x318   :  { %v7592_v35 = vpack.c.bf16 %v1531_v16, %v1528_v28  ;;  %v1513_v37 = vsel %vm1498_vm2, %v1491_v29, 0  ;;  %v7599_v43 = vsub.f32 %v1504_v17, %v1528_v28 }
 0x319   :  { %v1537_v40 = vand.u32 4294901760, %v1513_v37  ;;  %v1510_v41 = vsel %vm1498_vm2, %v1490_v31, 0  ;;  %2718 = vrot.lane.b32.xlu0 %v1490_v31, %s7259_s26  ;;  %v5826_v42 = vpop.f32.mrb[6].mxu1  ;;  %v1630_v25 = vand.u32 4294901760, %v7595_v39  ;;  %v7632_v31 = vand.u32 4294901760, %v1501_v8 }
 0x31a   :  { %v1534_v44 = vand.u32 4294901760, %v1510_v41  ;;  %v1493_v45 = vmul.f32 %v5826_v42, %v692_v33  ;;  %v1466_v48 = vpop.f32.mrb[7].mxu1  ;;  %6587 = vmatprep.subr.bf16.mxu1 %v7592_v35  ;;  %v1623_v54 = vand.u32 4294901760, %v7599_v43 }
 0x31b   :  { %v1643_v49 = vsub.f32 %v1513_v37, %v1537_v40  ;;  %v1492_v50 = vmul.f32 %v1466_v48, %v691_v38  ;;  %6589 = vmatpush3.bf16.xpose.msra.mxu1 %v7592_v35 }
 0x31c   :  { %v7603_v21 = vpack.c.bf16 %v1537_v40, %v1534_v44  ;;  %v1636_v22 = vsub.f32 %v1510_v41, %v1534_v44  ;;  %v1519_v52 = vsel %vm1498_vm2, %v1493_v45, 0  ;;  %v7622_v7 = vpack.c.bf16 %v1630_v25, %v1623_v54 }
 0x31d   :  { %v1644_v26 = vand.u32 4294901760, %v1643_v49  ;;  %v1543_v32 = vand.u32 4294901760, %v1519_v52  ;;  %v1516_v46 = vsel %vm1498_vm2, %v1492_v50, 0  ;;  %2720 = vrot.lane.b32.xlu0 %v1491_v29, %s7259_s26  ;;  %v5829_v53 = vpop.f32.mrb[8].mxu1  ;;  %v1624_v38 = vsub.f32 %v7599_v43, %v1623_v54  ;;  %v2121_v54 = vld [vmem:[#allocation2 + $0xe8] sm:$0xff] }
 0x31e   :  { %v1637_v13 = vand.u32 4294901760, %v1636_v22  ;;  %v1540_v14 = vand.u32 4294901760, %v1516_v46  ;;  %v1495_v12 = vmul.f32 %v5829_v53, %v694_v51  ;;  %v1478_v15 = vpop.f32.mrb[9].mxu1  ;;  %6591 = vmatprep.subr.bf16.mxu1 %v7603_v21  ;;  %v7613_v47 = vpack.c.bf16 %v1643_v49, %v1636_v22  ;;  %v2120_v53 = vld [vmem:[#allocation2 + $0xe0] sm:$0xff] }
 0x31f   :  { %v1657_v18 = vsub.f32 %v1519_v52, %v1543_v32  ;;  %v7611_v19 = vmul.f32 %v1478_v15, %v693_v23  ;;  %v1645_v36 = vsub.f32 %v1643_v49, %v1644_v26  ;;  %v1631_v40 = vsub.f32 %v7595_v39, %v1630_v25  ;;  %v2122_v15 = vld [vmem:[#allocation2 + $0xf0] sm:$0xff] }
 0x320   :  { %v7615_v55 = vpack.c.bf16 %v1543_v32, %v1540_v14  ;;  %v1650_v57 = vsub.f32 %v1516_v46, %v1540_v14  ;;  %v1525_v59 = vsel %vm1498_vm2, %v1495_v12, 0  ;;  %v1638_v63 = vsub.f32 %v1636_v22, %v1637_v13 }
 0x321   :  { %v1658_v60 = vand.u32 4294901760, %v1657_v18  ;;  %v1549_v61 = vand.u32 4294901760, %v1525_v59  ;;  %v1522_v62 = vsel %vm1498_vm2, %v7611_v19, 0  ;;  %2722 = vrot.lane.b32.xlu0 %v1492_v50, %s7259_s26  ;;  %v1646_v58 = vand.u32 4294901760, %v1645_v36 }
 0x322   :  { %v1651_v1 = vand.u32 4294901760, %v1650_v57  ;;  %v1546_v24 = vand.u32 4294901760, %v1522_v62  ;;  %v6626_v20 = vpack.c.bf16 %v1657_v18, %v1650_v57  ;;  %v1639_v3 = vand.u32 4294901760, %v1638_v63 }
 0x323   :  { %v1671_v0 = vsub.f32 %v1525_v59, %v1549_v61  ;;  %6593 = vmatpush3.bf16.xpose.msra.mxu1 %v7603_v21  ;;  %v1659_v5 = vsub.f32 %v1657_v18, %v1658_v60  ;;  %v7627_v11 = vpack.c.bf16 %v1644_v26, %v1637_v13  ;;  %v1611_v41 = vsub.f32 %v1501_v8, %v7632_v31  ;;  %v2123_v18 = vld [vmem:[#allocation2 + $0xf8] sm:$0xff]  ;;  %v2126_v59 = vld [vmem:[#allocation2 + $0x110] sm:$0xff] }
 0x324   :  { %v1664_v9 = vsub.f32 %v1522_v62, %v1546_v24  ;;  %6595 = vmatprep.subr.bf16.mxu1 %v7615_v55  ;;  %v1652_v10 = vsub.f32 %v1650_v57, %v1651_v1  ;;  %v6606_v17 = vpack.c.bf16 %v1646_v58, %v1639_v3  ;;  %v7630_v28 = vpack.c.bf16 %v1658_v60, %v1651_v1  ;;  %v2125_v57 = vld [vmem:[#allocation2 + $0x108] sm:$0xff] }
 0x325   :  { %v1672_v16 = vand.u32 4294901760, %v1671_v0  ;;  %2724 = vrot.lane.b32.xlu0 %v1493_v45, %s7259_s26  ;;  %v1660_v27 = vand.u32 4294901760, %v1659_v5  ;;  %v7635_v56 = vpack.c.bf16 %v1549_v61, %v1546_v24  ;;  %v1625_v42 = vand.u32 4294901760, %v1624_v38  ;;  %v2127_v61 = vld [vmem:[#allocation2 + $0x118] sm:$0xff] }
 0x326   :  { %v1665_v29 = vand.u32 4294901760, %v1664_v9  ;;  %v1653_v30 = vand.u32 4294901760, %v1652_v10  ;;  %v1632_v44 = vand.u32 4294901760, %v1631_v40  ;;  %v1612_v45 = vand.u32 4294901760, %v1611_v41 }
 0x327   :  { %v1673_v22 = vsub.f32 %v1671_v0, %v1672_v16  ;;  %v6618_v26 = vpack.c.bf16 %v7595_v39, %v7599_v43  ;;  %v6630_v32 = vpack.c.bf16 %v1671_v0, %v1664_v9  ;;  %v1497_v39 = vld [vmem:[#allocation2 + $0x1a8] sm:$0xff]  ;;  %v2135_v13 = vand.u32 4294901760, %v2120_v53 }
 0x328   :  { %v6610_v33 = vpack.c.bf16 %v1660_v27, %v1653_v30  ;;  %v6662_v37 = vpack.c.bf16 %v1672_v16, %v1665_v29  ;;  %v6602_v48 = vpack.c.bf16 %v1632_v44, %v1625_v42  ;;  %v1613_v49 = vsub.f32 %v1611_v41, %v1612_v45 }
 0x329   :  { %2728 = vrot.lane.b32.xlu0 %v1495_v12, %s7259_s26  ;;  %v1666_v51 = vsub.f32 %v1664_v9, %v1665_v29  ;;  %v1674_v23 = vand.u32 4294901760, %v1673_v22  ;;  %v2138_v14 = vand.u32 4294901760, %v2121_v54  ;;  %v2141_v36 = vand.u32 4294901760, %v2122_v15 }
 0x32a   :  { %v1614_v50 = vand.u32 4294901760, %v1613_v49  ;;  %v2150_v60 = vand.u32 4294901760, %v2125_v57  ;;  %v2153_v62 = vand.u32 4294901760, %v2126_v59  ;;  %v2156_v63 = vand.u32 4294901760, %v2127_v61 }
 0x32b   :  { %6597 = vmatpush3.bf16.xpose.msra.mxu1 %v7615_v55  ;;  %v1667_v52 = vand.u32 4294901760, %v1666_v51  ;;  %v7690_v12 = vpack.c.bf16 %v2138_v14, %v2135_v13  ;;  %v2229_v58 = vsub.f32 %v2120_v53, %v2135_v13  ;;  %v2243_v8 = vsub.f32 %v2122_v15, %v2141_v36 }
 0x32c   :  { %6599 = vmatprep.subr.bf16.mxu1 %v7635_v56  ;;  %v7700_v24 = vpack.c.bf16 %v2156_v63, %v2153_v62  ;;  %v2271_v42 = vsub.f32 %v2126_v59, %v2153_v62  ;;  %v2278_v44 = vsub.f32 %v2127_v61, %v2156_v63 }
 0x32d   :  { %v6614_v25 = vpack.c.bf16 %v1674_v23, %v1667_v52  ;;  %6683 = vmatprep.subr.bf16.mxu0 %v7690_v12  ;;  %v2230_v0 = vand.u32 4294901760, %v2229_v58  ;;  %v2244_v16 = vand.u32 4294901760, %v2243_v8 }
 0x32e   :  { %6685 = vmatpush3.bf16.msra.mxu0 %v7690_v12  ;;  %v2272_v49 = vand.u32 4294901760, %v2271_v42 }
 0x32f   :  { %v2231_v5 = vsub.f32 %v2229_v58, %v2230_v0 }
 0x330   :  { %v2273_v22 = vsub.f32 %v2271_v42, %v2272_v49 }
 0x331   :  { %v2232_v10 = vand.u32 4294901760, %v2231_v5 }
 0x333   :  { %6601 = vmatpush3.bf16.xpose.msra.mxu1 %v7635_v56 }
 0x334   :  { %6603 = vmatprep.subr.bf16.mxu1 %v6602_v48 }
 0x33a   :  { %5847 = vmatmul.mubr.f32.vlgmr.msra.gmra.mrb[10].mxu1 %v1614_v50  ;;  %v2279_v50 = vand.u32 4294901760, %v2278_v44 }
 0x33b   :  { %6605 = vmatpush3.bf16.xpose.msra.mxu1 %v6602_v48  ;;  %5865 = vmatprep.mubr.f32.mxu1 %v7568_v34 }
 0x33c   :  { %6607 = vmatprep.subr.bf16.mxu1 %v6606_v17  ;;  %v2280_v52 = vsub.f32 %v2278_v44, %v2279_v50 }
 0x343   :  { %6609 = vmatpush3.bf16.xpose.msra.mxu1 %v6606_v17 }
 0x344   :  { %6611 = vmatprep.subr.bf16.mxu1 %v6610_v33 }
 0x34b   :  { %6613 = vmatpush3.bf16.xpose.msra.mxu1 %v6610_v33 }
 0x34c   :  { %6615 = vmatprep.subr.bf16.mxu1 %v6614_v25 }
 0x353   :  { %6617 = vmatpush3.bf16.xpose.msra.mxu1 %v6614_v25  ;;  %v2274_v25 = vand.u32 4294901760, %v2273_v22 }
 0x354   :  { %6619 = vmatprep.subr.bf16.mxu1 %v6618_v26 }
 0x35a   :  { %5866 = vmatmul.mubr.f32.vlgmr.msra.gmra.mrb[10].mxu1 %v7632_v31 }
 0x35b   :  { %6621 = vmatpush3.bf16.xpose.msra.mxu1 %v6618_v26  ;;  %5884 = vmatprep.mubr.f32.mxu1 %v7573_v2  ;;  %v1496_v2 = vld [vmem:[#allocation2 + $0x1a0] sm:$0xff]  ;;  %v2281_v26 = vand.u32 4294901760, %v2280_v52 }
 0x35c   :  { %6623 = vmatprep.subr.bf16.mxu1 %v7613_v47 }
 0x363   :  { %6625 = vmatpush3.bf16.xpose.msra.mxu1 %v7613_v47  ;;  %v2144_v47 = vand.u32 4294901760, %v2123_v18 }
 0x364   :  { %6627 = vmatprep.subr.bf16.mxu1 %v6626_v20 }
 0x365   :  { %v2250_v9 = vsub.f32 %v2123_v18, %v2144_v47 }
 0x367   :  { %v2251_v17 = vand.u32 4294901760, %v2250_v9 }
 0x369   :  { %v2252_v29 = vsub.f32 %v2250_v9, %v2251_v17 }
 0x36b   :  { %6629 = vmatpush3.bf16.xpose.msra.mxu1 %v6626_v20  ;;  %v2236_v20 = vsub.f32 %v2121_v54, %v2138_v14  ;;  %v7706_v54 = vpack.c.bf16 %v2279_v50, %v2272_v49 }
 0x36c   :  { %6631 = vmatprep.subr.bf16.mxu1 %v6630_v32 }
 0x36d   :  { %v2237_v3 = vand.u32 4294901760, %v2236_v20 }
 0x373   :  { %6633 = vmatpush3.bf16.xpose.msra.mxu1 %v6630_v32  ;;  %v6710_v32 = vpack.c.bf16 %v2281_v26, %v2274_v25 }
 0x374   :  { %6635 = vmatprep.subr.bf16.mxu1 %v7592_v35 }
 0x37a   :  { %5885 = vmatmul.mubr.f32.vlgmr.msra.gmra.mrb[10].mxu1 %v1611_v41 }
 0x37b   :  { %6637 = vmatpush3.bf16.xpose.msra.mxu1 %v7592_v35  ;;  %5903 = vmatprep.mubr.f32.mxu1 %v1602_v4 }
 0x37c   :  { %6639 = vmatprep.subr.bf16.mxu1 %v7603_v21 }
 0x383   :  { %6641 = vmatpush3.bf16.xpose.msra.mxu1 %v7603_v21 }
 0x384   :  { %6643 = vmatprep.subr.bf16.mxu1 %v7615_v55 }
 0x387   :  { %v2715_v5 = vpop.permute.xlu0 %2714 }
 0x38b   :  { %6645 = vmatpush3.bf16.xpose.msra.mxu1 %v7615_v55 }
 0x38c   :  { %6647 = vmatprep.subr.bf16.mxu1 %v7635_v56 }
 0x393   :  { %6649 = vmatpush3.bf16.xpose.msra.mxu1 %v7635_v56 }
 0x394   :  { %6651 = vmatprep.subr.bf16.mxu1 %v7622_v7 }
 0x39a   :  { %5904 = vmatmul.mubr.f32.vlgmr.msra.gmra.mrb[10].mxu1 %v1612_v45 }
 0x39b   :  { %6653 = vmatpush3.bf16.xpose.msra.mxu1 %v7622_v7  ;;  %5922 = vmatprep.mubr.f32.mxu1 %v7568_v34  ;;  %v2238_v7 = vsub.f32 %v2236_v20, %v2237_v3 }
 0x39c   :  { %6655 = vmatprep.subr.bf16.mxu1 %v7627_v11 }
 0x3a3   :  { %6657 = vmatpush3.bf16.xpose.msra.mxu1 %v7627_v11  ;;  %v2239_v11 = vand.u32 4294901760, %v2238_v7  ;;  %v2719_v7 = vpop.permute.xlu0 %2718 }
 0x3a4   :  { %6659 = vmatprep.subr.bf16.mxu1 %v7630_v28 }
 0x3a5   :  { %v6698_v27 = vpack.c.bf16 %v2239_v11, %v2232_v10 }
 0x3ab   :  { %6661 = vmatpush3.bf16.xpose.msra.mxu1 %v7630_v28  ;;  %v2245_v28 = vsub.f32 %v2243_v8, %v2244_v16 }
 0x3ac   :  { %6663 = vmatprep.subr.bf16.mxu1 %v6662_v37 }
 0x3ad   :  { %v2246_v33 = vand.u32 4294901760, %v2245_v28 }
 0x3b3   :  { %6665 = vmatpush3.bf16.xpose.msra.mxu1 %v6662_v37  ;;  %v2253_v37 = vand.u32 4294901760, %v2252_v29 }
 0x3b4   :  { %6667 = vmatprep.subr.bf16.mxu1 %v7592_v35 }
 0x3b5   :  { %v6702_v40 = vpack.c.bf16 %v2253_v37, %v2246_v33 }
 0x3ba   :  { %5923 = vmatmul.mubr.f32.vlgmr.msra.gmra.mrb[10].mxu1 %v7632_v31 }
 0x3bb   :  { %6669 = vmatpush3.bf16.xpose.msra.mxu1 %v7592_v35  ;;  %5941 = vmatprep.mubr.f32.mxu1 %v7568_v34 }
 0x3bc   :  { %6671 = vmatprep.subr.bf16.mxu1 %v7603_v21 }
 0x3c3   :  { %6673 = vmatpush3.bf16.xpose.msra.mxu1 %v7603_v21 }
 0x3c4   :  { %6675 = vmatprep.subr.bf16.mxu1 %v7615_v55 }
 0x3cb   :  { %6677 = vmatpush3.bf16.xpose.msra.mxu1 %v7615_v55  ;;  %v7694_v55 = vpack.c.bf16 %v2144_v47, %v2141_v36 }
 0x3cc   :  { %6679 = vmatprep.subr.bf16.mxu1 %v7635_v56 }
 0x3cd   :  { %6687 = vmatprep.subr.bf16.mxu0 %v7694_v55 }
 0x3ce   :  { %6689 = vmatpush3.bf16.msra.mxu0 %v7694_v55 }
 0x3d3   :  { %6681 = vmatpush3.bf16.xpose.msra.mxu1 %v7635_v56 }
 0x3da   :  { %5942 = vmatmul.mubr.f32.vlgmr.msra.gmra.mrb[10].mxu1 %v7632_v31  ;;  %v2264_v31 = vsub.f32 %v2125_v57, %v2150_v60 }
 0x3dc   :  { %v2265_v38 = vand.u32 4294901760, %v2264_v31 }
 0x3de   :  { %v2266_v45 = vsub.f32 %v2264_v31, %v2265_v38 }
 0x3e0   :  { %v2267_v51 = vand.u32 4294901760, %v2266_v45 }
 0x4ad   :  { %v5943_v4 = vpop.f32.mrb[10].mxu1 }
 0x4ae   :  { %v2097_v35 = vpop.f32.mrb[11].mxu1  ;;  %v7680_v43 = vadd.f32 %v5943_v4, %v1497_v39  ;;  %v6718_v4 = vpack.c.bf16 %v2250_v9, %v2243_v8  ;;  %v2721_v8 = vpop.permute.xlu0 %2720 }
 0x4af   :  { %v7678_v34 = vadd.f32 %v2097_v35, %v1496_v2  ;;  %v6714_v2 = vpack.c.bf16 %v2236_v20, %v2229_v58  ;;  %v6726_v35 = vpack.c.bf16 %v2278_v44, %v2271_v42 }
 0x4b0   :  { %v2111_v46 = vsel %vm2107_vm3, %v7680_v43, -inf }
 0x4b1   :  { %v2108_v21 = vsel %vm2107_vm3, %v7678_v34, -inf }
 0x4b2   :  { %2109 = vmax.xlane.f32.xlu1 %v2108_v21  ;;  %v6746_v21 = vpack.c.bf16 %v2237_v3, %v2230_v0  ;;  %v2723_v10 = vpop.permute.xlu0 %2722 }
 0x4b6   :  { %2112 = vmax.xlane.f32.xlu1 %v2111_v46  ;;  %v6750_v46 = vpack.c.bf16 %v2251_v17, %v2244_v16  ;;  %v2739_v16 = vand.u32 4294901760, %v2715_v5  ;;  %v2748_v17 = vand.u32 4294901760, %v2721_v8  ;;  %v2725_v28 = vpop.permute.xlu0 %2724 }
 0x4b8   :  { %v7769_v29 = vsub.f32 %v2715_v5, %v2739_v16 }
 0x4c7   :  { %2716 = vrot.lane.b32.xlu1 %v7586_v6, %s7259_s26  ;;  %v2124_v6 = vld [vmem:[#allocation2 + $0x100] sm:$0xff] }
 0x4cb   :  { %2726 = vrot.lane.b32.xlu1 %v7611_v19, %s7259_s26  ;;  %v2147_v19 = vand.u32 4294901760, %v2124_v6 }
 0x4cd   :  { %v7698_v1 = vpack.c.bf16 %v2150_v60, %v2147_v19  ;;  %v2257_v30 = vsub.f32 %v2124_v6, %v2147_v19 }
 0x4cf   :  { %6691 = vmatprep.subr.bf16.mxu0 %v7698_v1  ;;  %v2258_v56 = vand.u32 4294901760, %v2257_v30  ;;  %v6722_v39 = vpack.c.bf16 %v2264_v31, %v2257_v30 }
 0x4d0   :  { %6693 = vmatpush3.bf16.msra.mxu0 %v7698_v1 }
 0x4d1   :  { %6695 = vmatprep.subr.bf16.mxu0 %v7700_v24  ;;  %v2259_v41 = vsub.f32 %v2257_v30, %v2258_v56  ;;  %v6754_v53 = vpack.c.bf16 %v2265_v38, %v2258_v56  ;;  %v7772_v30 = vsub.f32 %v2721_v8, %v2748_v17  ;;  %v2751_v38 = vand.u32 4294901760, %v2723_v10 }
 0x4d3   :  { %v2260_v48 = vand.u32 4294901760, %v2259_v41  ;;  %v2729_v41 = vpop.permute.xlu0 %2728 }
 0x4d4   :  { %6697 = vmatpush3.bf16.msra.mxu0 %v7700_v24  ;;  %v2760_v22 = vand.u32 4294901760, %v2729_v41 }
 0x4d5   :  { %6699 = vmatprep.subr.bf16.mxu0 %v6698_v27  ;;  %v6706_v23 = vpack.c.bf16 %v2267_v51, %v2260_v48  ;;  %v7797_v51 = vsub.f32 %v2723_v10, %v2751_v38  ;;  %v3326_v10 = vld [vmem:[#allocation2 + $0x130] sm:$0xff] }
 0x53f   :  { %v2110_v13 = vpop.xlane.xlu1 %2109 }
 0x540   :  { %v2114_v14 = vsub.f32 %v7678_v34, %v2110_v13 }
 0x542   :  { %v2116_v15 = vmul.f32 1.442695, %v2114_v14 }
 0x543   :  { %v2113_v18 = vpop.xlane.xlu1 %2112 }
 0x544   :  { %7190 = vpow2.f32 %v2116_v15  ;;  %v2115_v36 = vsub.f32 %v7680_v43, %v2113_v18 }
 0x546   :  { %v2118_v47 = vmul.f32 1.442695, %v2115_v36 }
 0x547   :  { %v2717_v9 = vpop.permute.xlu1 %2716 }
 0x548   :  { %7192 = vpow2.f32 %v2118_v47  ;;  %v2742_v11 = vand.u32 4294901760, %v2717_v9 }
 0x54b   :  { %v2727_v37 = vpop.permute.xlu1 %2726 }
 0x54c   :  { %v2757_v48 = vand.u32 4294901760, %v2727_v37 }
 0x54e   :  { %v7191_v6 = vpop.eup %7190  ;;  %v7804_v25 = vpack.c.bf16 %v2760_v22, %v2757_v48  ;;  %v7806_v26 = vsub.f32 %v2727_v37, %v2757_v48 }
 0x54f   :  { %v2129_v57 = vsel %vm2107_vm3, %v7191_v6, 0 }
 0x550   :  { %v7711_v59 = vand.u32 4294901760, %v2129_v57 }
 0x552   :  { %v7193_v19 = vpop.eup %7192  ;;  %v7714_v60 = vsub.f32 %v2129_v57, %v7711_v59 }
 0x553   :  { %v2132_v61 = vsel %vm2107_vm3, %v7193_v19, 0 }
 0x554   :  { %v7717_v62 = vand.u32 4294901760, %v2132_v61  ;;  %v7720_v34 = vand.u32 4294901760, %v7714_v60 }
 0x556   :  { %v7723_v43 = vsub.f32 %v2132_v61, %v7717_v62  ;;  %v2210_v63 = vsub.f32 %v7714_v60, %v7720_v34 }
 0x558   :  { %v7727_v58 = vand.u32 4294901760, %v2210_v63  ;;  %v7730_v20 = vand.u32 4294901760, %v7723_v43 }
 0x55a   :  { %5960 = vmatprep.mubr.f32.mxu0 %v7727_v58  ;;  %v2220_v0 = vsub.f32 %v7723_v43, %v7730_v20 }
 0x55c   :  { %v7735_v3 = vand.u32 4294901760, %v2220_v0 }
 0x55e   :  { %5961 = vmatmul.mubr.f32.vlgmr.msra.gmra.mrb[2].mxu0 %v7735_v3 }
 0x55f   :  { %6701 = vmatpush3.bf16.msra.mxu0 %v6698_v27  ;;  %5979 = vmatprep.mubr.f32.mxu0 %v7711_v59  ;;  %v7764_v27 = vpack.c.bf16 %v2742_v11, %v2739_v16 }
 0x560   :  { %6703 = vmatprep.subr.bf16.mxu0 %v6702_v40 }
 0x563   :  { %6705 = vmatpush3.bf16.msra.mxu0 %v6702_v40  ;;  %v2855_v40 = vand.u32 4294901760, %v7772_v30 }
 0x564   :  { %6707 = vmatprep.subr.bf16.mxu0 %v6706_v23 }
 0x565   :  { %v2856_v52 = vsub.f32 %v7772_v30, %v2855_v40 }
 0x567   :  { %6709 = vmatpush3.bf16.msra.mxu0 %v6706_v23 }
 0x568   :  { %6711 = vmatprep.subr.bf16.mxu0 %v6710_v32 }
 0x56b   :  { %6713 = vmatpush3.bf16.msra.mxu0 %v6710_v32 }
 0x56c   :  { %6715 = vmatprep.subr.bf16.mxu0 %v6714_v2 }
 0x56e   :  { %5980 = vmatmul.mubr.f32.vlgmr.msra.gmra.mrb[2].mxu0 %v7717_v62 }
 0x56f   :  { %6717 = vmatpush3.bf16.msra.mxu0 %v6714_v2  ;;  %5998 = vmatprep.mubr.f32.mxu0 %v7714_v60 }
 0x570   :  { %6719 = vmatprep.subr.bf16.mxu0 %v6718_v4 }
 0x573   :  { %6721 = vmatpush3.bf16.msra.mxu0 %v6718_v4  ;;  %v2862_v4 = vand.u32 4294901760, %v7797_v51 }
 0x574   :  { %6723 = vmatprep.subr.bf16.mxu0 %v6722_v39 }
 0x575   :  { %v2863_v13 = vsub.f32 %v7797_v51, %v2862_v4 }
 0x577   :  { %6725 = vmatpush3.bf16.msra.mxu0 %v6722_v39  ;;  %v7813_v39 = vsub.f32 %v2729_v41, %v2760_v22  ;;  %v2864_v57 = vand.u32 4294901760, %v2863_v13 }
 0x578   :  { %6727 = vmatprep.subr.bf16.mxu0 %v6726_v35 }
 0x579   :  { %v2883_v14 = vand.u32 4294901760, %v7813_v39 }
 0x57b   :  { %6729 = vmatpush3.bf16.msra.mxu0 %v6726_v35  ;;  %v2884_v6 = vsub.f32 %v7813_v39, %v2883_v14 }
 0x57c   :  { %6731 = vmatprep.subr.bf16.mxu0 %v7690_v12 }
 0x57d   :  { %v2885_v63 = vand.u32 4294901760, %v2884_v6 }
 0x57e   :  { %5999 = vmatmul.mubr.f32.vlgmr.msra.gmra.mrb[2].mxu0 %v7723_v43 }
 0x57f   :  { %6733 = vmatpush3.bf16.msra.mxu0 %v7690_v12  ;;  %6017 = vmatprep.mubr.f32.mxu0 %v7720_v34 }
 0x580   :  { %6735 = vmatprep.subr.bf16.mxu0 %v7694_v55 }
 0x583   :  { %6737 = vmatpush3.bf16.msra.mxu0 %v7694_v55 }
 0x584   :  { %6739 = vmatprep.subr.bf16.mxu0 %v7698_v1 }
 0x587   :  { %6741 = vmatpush3.bf16.msra.mxu0 %v7698_v1 }
 0x588   :  { %6743 = vmatprep.subr.bf16.mxu0 %v7700_v24 }
 0x58b   :  { %6745 = vmatpush3.bf16.msra.mxu0 %v7700_v24 }
 0x58c   :  { %6747 = vmatprep.subr.bf16.mxu0 %v6746_v21 }
 0x58e   :  { %6018 = vmatmul.mubr.f32.vlgmr.msra.gmra.mrb[2].mxu0 %v7730_v20 }
 0x58f   :  { %6749 = vmatpush3.bf16.msra.mxu0 %v6746_v21  ;;  %6036 = vmatprep.mubr.f32.mxu0 %v7711_v59 }
 0x590   :  { %6751 = vmatprep.subr.bf16.mxu0 %v6750_v46 }
 0x593   :  { %6753 = vmatpush3.bf16.msra.mxu0 %v6750_v46  ;;  %v2876_v46 = vand.u32 4294901760, %v7806_v26 }
 0x594   :  { %6755 = vmatprep.subr.bf16.mxu0 %v6754_v53 }
 0x595   :  { %v2877_v18 = vsub.f32 %v7806_v26, %v2876_v46  ;;  %v6854_v8 = vpack.c.bf16 %v2883_v14, %v2876_v46 }
 0x597   :  { %6757 = vmatpush3.bf16.msra.mxu0 %v6754_v53  ;;  %v2878_v61 = vand.u32 4294901760, %v2877_v18 }
 0x598   :  { %6759 = vmatprep.subr.bf16.mxu0 %v7706_v54 }
 0x59b   :  { %6761 = vmatpush3.bf16.msra.mxu0 %v7706_v54  ;;  %v2857_v54 = vand.u32 4294901760, %v2856_v52 }
 0x59c   :  { %6763 = vmatprep.subr.bf16.mxu0 %v7690_v12 }
 0x59e   :  { %6037 = vmatmul.mubr.f32.vlgmr.msra.gmra.mrb[2].mxu0 %v7717_v62 }
 0x59f   :  { %6765 = vmatpush3.bf16.msra.mxu0 %v7690_v12  ;;  %6055 = vmatprep.mubr.f32.mxu0 %v7711_v59  ;;  %v7766_v12 = vsub.f32 %v2717_v9, %v2742_v11  ;;  %v3325_v9 = vld [vmem:[#allocation2 + $0x128] sm:$0xff] }
 0x5a0   :  { %6767 = vmatprep.subr.bf16.mxu0 %v7694_v55  ;;  %v3343_v16 = vand.u32 4294901760, %v3325_v9 }
 0x5a1   :  { %v2841_v33 = vand.u32 4294901760, %v7766_v12  ;;  %v6810_v0 = vpack.c.bf16 %v7766_v12, %v7769_v29 }
 0x5a3   :  { %6769 = vmatpush3.bf16.msra.mxu0 %v7694_v55  ;;  %v2745_v55 = vand.u32 4294901760, %v2719_v7  ;;  %v2842_v45 = vsub.f32 %v7766_v12, %v2841_v33 }
 0x5a4   :  { %6771 = vmatprep.subr.bf16.mxu0 %v7698_v1 }
 0x5a5   :  { %v7774_v31 = vpack.c.bf16 %v2748_v17, %v2745_v55  ;;  %v7781_v56 = vsub.f32 %v2719_v7, %v2745_v55  ;;  %v2843_v32 = vand.u32 4294901760, %v2842_v45  ;;  %v6822_v7 = vpack.c.bf16 %v7813_v39, %v7806_v26  ;;  %v7206_v26 = vld [vmem:[%s7991_s0 + $0x8] sm:$0xff] }
 0x5a6   :  { %v3346_v17 = vand.u32 4294901760, %v3326_v10  ;;  %v3437_v55 = vsub.f32 %v3325_v9, %v3343_v16  ;;  %3879 = vrot.lane.b32.xlu0 %v7206_v26, %s7260_s29 }
 0x5a7   :  { %6773 = vmatpush3.bf16.msra.mxu0 %v7698_v1  ;;  %v2754_v1 = vand.u32 4294901760, %v2725_v28  ;;  %v2848_v50 = vand.u32 4294901760, %v7781_v56 }
 0x5a8   :  { %6775 = vmatprep.subr.bf16.mxu0 %v7700_v24 }
 0x5a9   :  { %v7785_v42 = vpack.c.bf16 %v2754_v1, %v2751_v38  ;;  %v7787_v44 = vsub.f32 %v2725_v28, %v2754_v1  ;;  %v2849_v2 = vsub.f32 %v7781_v56, %v2848_v50 }
 0x5ab   :  { %6777 = vmatpush3.bf16.msra.mxu0 %v7700_v24  ;;  %v2834_v24 = vand.u32 4294901760, %v7769_v29  ;;  %v2869_v23 = vand.u32 4294901760, %v7787_v44  ;;  %v2850_v15 = vand.u32 4294901760, %v2849_v2  ;;  %v6818_v5 = vpack.c.bf16 %v7787_v44, %v7797_v51 }
 0x5ac   :  { %6779 = vmatprep.subr.bf16.mxu0 %v7764_v27 }
 0x5ad   :  { %v2835_v49 = vsub.f32 %v7769_v29, %v2834_v24  ;;  %v2870_v21 = vsub.f32 %v7787_v44, %v2869_v23  ;;  %v6798_v36 = vpack.c.bf16 %v2857_v54, %v2850_v15 }
 0x5ae   :  { %6056 = vmatmul.mubr.f32.vlgmr.msra.gmra.mrb[2].mxu0 %v7717_v62 }
 0x5af   :  { %6781 = vmatpush3.bf16.msra.mxu0 %v7764_v27  ;;  %6074 = vmatprep.mubr.f32.mxu0 %v7727_v58  ;;  %v2836_v35 = vand.u32 4294901760, %v2835_v49  ;;  %v2871_v47 = vand.u32 4294901760, %v2870_v21  ;;  %v6806_v58 = vpack.c.bf16 %v2885_v63, %v2878_v61 }
 0x5b0   :  { %6783 = vmatprep.subr.bf16.mxu0 %v7774_v31 }
 0x5b1   :  { %v6794_v53 = vpack.c.bf16 %v2843_v32, %v2836_v35  ;;  %v6802_v19 = vpack.c.bf16 %v2871_v47, %v2864_v57  ;;  %v7207_v32 = vld [vmem:[%s7991_s0] sm:$0xff]  ;;  %s7261_s0 = smov [#allocation5]  }
 0x5b2   :  { %3877 = vrot.lane.b32.xlu1 %v7207_v32, %s7260_s29  ;;  %s5099_s4 = sshll.u32 %s7261_s0, 4  ;;  %s5100_s4 = int_to_ptr.vmem [resolvable:$true] %s5099_s4 }
 0x5b3   :  { %6785 = vmatpush3.bf16.msra.mxu0 %v7774_v31  ;;  %s7230_s5 = scalar_lea.vmem %s5100_s4, 256  ;;  %p7235_p9 = scmp.lt.s32.totalorder %s5100_s4, %s5100_s4 }
 0x5b4   :  { %6787 = vmatprep.subr.bf16.mxu0 %v7785_v42  ;;  %p7231_p8 = scmp.ne.s32.totalorder %s5100_s4, %s7230_s5  ;;  %p7236_p10 = scmp.lt.s32.totalorder %s7230_s5, %s7230_s5 }
 0x5b6   :  { %p7237_p11 = por %p7236_p10, %p7235_p9 }
 0x5b7   :  { %6789 = vmatpush3.bf16.msra.mxu0 %v7785_v42 }
 0x5b8   :  { %6791 = vmatprep.subr.bf16.mxu0 %v7804_v25  ;;  %p7238_p12 = pnand %p7237_p11, %p7231_p8 }
 0x5bb   :  { %6793 = vmatpush3.bf16.msra.mxu0 %v7804_v25 }
 0x5bc   :  { %6795 = vmatprep.subr.bf16.mxu0 %v6794_v53 }
 0x5be   :  { %6075 = vmatmul.mubr.f32.vlgmr.msra.gmra.mrb[4].mxu0 %v7735_v3  ;;  %v6814_v3 = vpack.c.bf16 %v7772_v30, %v7781_v56 }
 0x5bf   :  { %6797 = vmatpush3.bf16.msra.mxu0 %v6794_v53  ;;  %6093 = vmatprep.mubr.f32.mxu0 %v7711_v59 }
 0x5c0   :  { %6799 = vmatprep.subr.bf16.mxu0 %v6798_v36 }
 0x5c3   :  { %6801 = vmatpush3.bf16.msra.mxu0 %v6798_v36 }
 0x5c4   :  { %6803 = vmatprep.subr.bf16.mxu0 %v6802_v19 }
 0x5c7   :  { %6805 = vmatpush3.bf16.msra.mxu0 %v6802_v19 }
 0x5c8   :  { %6807 = vmatprep.subr.bf16.mxu0 %v6806_v58 }
 0x5cb   :  { %6809 = vmatpush3.bf16.msra.mxu0 %v6806_v58 }
 0x5cc   :  { %6811 = vmatprep.subr.bf16.mxu0 %v6810_v0 }
 0x5ce   :  { %6094 = vmatmul.mubr.f32.vlgmr.msra.gmra.mrb[4].mxu0 %v7717_v62 }
 0x5cf   :  { %6813 = vmatpush3.bf16.msra.mxu0 %v6810_v0  ;;  %6112 = vmatprep.mubr.f32.mxu0 %v7714_v60  ;;  %v6842_v60 = vpack.c.bf16 %v2841_v33, %v2834_v24  ;;  %v3444_v33 = vsub.f32 %v3326_v10, %v3346_v17  ;;  %v5111_v0 = vld [vmem:[#allocation2 + $0x1b0] ss:$0 sm:$0xff] }
 0x5d0   :  { %6815 = vmatprep.subr.bf16.mxu0 %v6814_v3 }
 0x5d1   :  { %v3445_v38 = vand.u32 4294901760, %v3444_v33 }
 0x5d3   :  { %6817 = vmatpush3.bf16.msra.mxu0 %v6814_v3 }
 0x5d4   :  { %6819 = vmatprep.subr.bf16.mxu0 %v6818_v5 }
 0x5d7   :  { %6821 = vmatpush3.bf16.msra.mxu0 %v6818_v5 }
 0x5d8   :  { %6823 = vmatprep.subr.bf16.mxu0 %v6822_v7 }
 0x5db   :  { %6825 = vmatpush3.bf16.msra.mxu0 %v6822_v7 }
 0x5dc   :  { %6827 = vmatprep.subr.bf16.mxu0 %v7764_v27 }
 0x5de   :  { %6113 = vmatmul.mubr.f32.vlgmr.msra.gmra.mrb[4].mxu0 %v7723_v43  ;;  %v6850_v43 = vpack.c.bf16 %v2869_v23, %v2862_v4 }
 0x5df   :  { %6829 = vmatpush3.bf16.msra.mxu0 %v7764_v27  ;;  %6131 = vmatprep.mubr.f32.mxu0 %v7720_v34  ;;  %v6846_v34 = vpack.c.bf16 %v2855_v40, %v2848_v50 }
 0x5e0   :  { %6831 = vmatprep.subr.bf16.mxu0 %v7774_v31 }
 0x5e3   :  { %6833 = vmatpush3.bf16.msra.mxu0 %v7774_v31 }
 0x5e4   :  { %6835 = vmatprep.subr.bf16.mxu0 %v7785_v42 }
 0x5e7   :  { %6837 = vmatpush3.bf16.msra.mxu0 %v7785_v42 }
 0x5e8   :  { %6839 = vmatprep.subr.bf16.mxu0 %v7804_v25 }
 0x5eb   :  { %6841 = vmatpush3.bf16.msra.mxu0 %v7804_v25 }
 0x5ec   :  { %6843 = vmatprep.subr.bf16.mxu0 %v6842_v60 }
 0x5ee   :  { %6132 = vmatmul.mubr.f32.vlgmr.msra.gmra.mrb[4].mxu0 %v7730_v20  ;;  %v3324_v20 = vld [vmem:[#allocation2 + $0x120] sm:$0xff] }
 0x5ef   :  { %6845 = vmatpush3.bf16.msra.mxu0 %v6842_v60  ;;  %6150 = vmatprep.mubr.f32.mxu0 %v7711_v59  ;;  %v3340_v11 = vand.u32 4294901760, %v3324_v20 }
 0x5f0   :  { %6847 = vmatprep.subr.bf16.mxu0 %v6846_v34 }
 0x5f1   :  { %v7870_v12 = vpack.c.bf16 %v3343_v16, %v3340_v11  ;;  %v3430_v29 = vsub.f32 %v3324_v20, %v3340_v11 }
 0x5f3   :  { %6849 = vmatpush3.bf16.msra.mxu0 %v6846_v34  ;;  %6875 = vmatprep.subr.bf16.mxu1 %v7870_v12  ;;  %v3431_v30 = vand.u32 4294901760, %v3430_v29  ;;  %v6890_v50 = vpack.c.bf16 %v3437_v55, %v3430_v29 }
 0x5f4   :  { %6851 = vmatprep.subr.bf16.mxu0 %v6850_v43  ;;  %6877 = vmatpush3.bf16.msra.mxu1 %v7870_v12 }
 0x5f7   :  { %6853 = vmatpush3.bf16.msra.mxu0 %v6850_v43 }
 0x5f8   :  { %6855 = vmatprep.subr.bf16.mxu0 %v6854_v8 }
 0x5fb   :  { %6857 = vmatpush3.bf16.msra.mxu0 %v6854_v8 }
 0x5fc   :  { %6859 = vmatprep.subr.bf16.mxu0 %v7764_v27 }
 0x5fe   :  { %6151 = vmatmul.mubr.f32.vlgmr.msra.gmra.mrb[4].mxu0 %v7717_v62 }
 0x5ff   :  { %6861 = vmatpush3.bf16.msra.mxu0 %v7764_v27  ;;  %6169 = vmatprep.mubr.f32.mxu0 %v7711_v59  ;;  %v3327_v59 = vld [vmem:[#allocation2 + $0x138] sm:$0xff] }
 0x600   :  { %6863 = vmatprep.subr.bf16.mxu0 %v7774_v31  ;;  %v3349_v27 = vand.u32 4294901760, %v3327_v59 }
 0x602   :  { %v7872_v28 = vpack.c.bf16 %v3349_v27, %v3346_v17  ;;  %v3451_v37 = vsub.f32 %v3327_v59, %v3349_v27 }
 0x603   :  { %6865 = vmatpush3.bf16.msra.mxu0 %v7774_v31  ;;  %v3432_v31 = vsub.f32 %v3430_v29, %v3431_v30 }
 0x604   :  { %6867 = vmatprep.subr.bf16.mxu0 %v7785_v42  ;;  %6879 = vmatprep.subr.bf16.mxu1 %v7872_v28  ;;  %v3452_v40 = vand.u32 4294901760, %v3451_v37  ;;  %v6894_v51 = vpack.c.bf16 %v3451_v37, %v3444_v33 }
 0x605   :  { %6881 = vmatpush3.bf16.msra.mxu1 %v7872_v28  ;;  %v3433_v24 = vand.u32 4294901760, %v3432_v31  ;;  %v3917_v31 = vld [vmem:[#allocation2 + $0x148] sm:$0xff] }
 0x606   :  { %v3453_v44 = vsub.f32 %v3451_v37, %v3452_v40  ;;  %v3935_v37 = vand.u32 4294901760, %v3917_v31 }
 0x607   :  { %6869 = vmatpush3.bf16.msra.mxu0 %v7785_v42  ;;  %v3446_v42 = vsub.f32 %v3444_v33, %v3445_v38 }
 0x608   :  { %6871 = vmatprep.subr.bf16.mxu0 %v7804_v25  ;;  %v3454_v48 = vand.u32 4294901760, %v3453_v44  ;;  %v4029_v44 = vsub.f32 %v3917_v31, %v3935_v37  ;;  %v4463_v31 = vld [vmem:[#allocation2 + $0x170] sm:$0xff] }
 0x609   :  { %v3447_v45 = vand.u32 4294901760, %v3446_v42 }
 0x60b   :  { %6873 = vmatpush3.bf16.msra.mxu0 %v7804_v25  ;;  %v6886_v49 = vpack.c.bf16 %v3454_v48, %v3447_v45  ;;  %v6910_v25 = vpack.c.bf16 %v3452_v40, %v3445_v38  ;;  %v4030_v48 = vand.u32 4294901760, %v4029_v44 }
 0x60e   :  { %6170 = vmatmul.mubr.f32.vlgmr.msra.gmra.mrb[4].mxu0 %v7717_v62  ;;  %v3438_v62 = vand.u32 4294901760, %v3437_v55 }
 0x610   :  { %v3439_v1 = vsub.f32 %v3437_v55, %v3438_v62  ;;  %v6906_v23 = vpack.c.bf16 %v3438_v62, %v3431_v30  ;;  %v3916_v62 = vld [vmem:[#allocation2 + $0x140] sm:$0xff] }
 0x611   :  { %v3932_v33 = vand.u32 4294901760, %v3916_v62 }
 0x612   :  { %v3440_v56 = vand.u32 4294901760, %v3439_v1  ;;  %v3918_v1 = vld [vmem:[#allocation2 + $0x150] sm:$0xff] }
 0x613   :  { %v7898_v40 = vpack.c.bf16 %v3935_v37, %v3932_v33  ;;  %v4022_v42 = vsub.f32 %v3916_v62, %v3932_v33  ;;  %v4487_v33 = vand.u32 4294901760, %v4463_v31 }
 0x614   :  { %v6882_v41 = vpack.c.bf16 %v3440_v56, %v3433_v24  ;;  %v3919_v24 = vld [vmem:[#allocation2 + $0x158] sm:$0xff]  ;;  %v3938_v56 = vand.u32 4294901760, %v3918_v1 }
 0x615   :  { %v3941_v38 = vand.u32 4294901760, %v3919_v24  ;;  %v4023_v45 = vand.u32 4294901760, %v4022_v42 }
 0x616   :  { %6883 = vmatprep.subr.bf16.mxu1 %v6882_v41 }
 0x618   :  { %v3880_v5 = vpop.permute.xlu0 %3879 }
 0x624   :  { %v3878_v34 = vpop.permute.xlu1 %3877 }
 0x681   :  { %v6057_v22 = vpop.f32.mrb[2].mxu0 }
 0x682   :  { %v2704_v52 = vpop.f32.mrb[3].mxu0  ;;  %v3319_v2 = vmax.f32 %v6057_v22, 1e-30  ;;  %v4043_v22 = vsub.f32 %v3919_v24, %v3941_v38 }
 0x683   :  { %v3318_v4 = vmax.f32 %v2704_v52, 1e-30 }
 0x684   :  { %7194 = vrcp.f32 %v3319_v2  ;;  %v4044_v26 = vand.u32 4294901760, %v4043_v22 }
 0x685   :  { %7196 = vrcp.f32 %v3318_v4 }
 0x686   :  { %v4045_v4 = vsub.f32 %v4043_v22, %v4044_v26 }
 0x68e   :  { %v7195_v39 = vpop.eup %7194 }
 0x68f   :  { %v7197_v21 = vpop.eup %7196 }
 0x6e1   :  { %v6171_v35 = vpop.f32.mrb[4].mxu0 }
 0x6e2   :  { %v3323_v46 = vmul.f32 %v7195_v39, %v6171_v35  ;;  %v3308_v53 = vpop.f32.mrb[5].mxu0  ;;  %v4046_v35 = vand.u32 4294901760, %v4045_v4 }
 0x6e3   :  { %v3321_v54 = vmul.f32 %v7197_v21, %v3308_v53 }
 0x6e4   :  { %v3337_v13 = vsel %vm1498_vm2, %v3323_v46, 0  ;;  %v6938_v46 = vpack.c.bf16 %v4029_v44, %v4022_v42 }
 0x6e5   :  { %v3418_v14 = vand.u32 4294901760, %v3337_v13  ;;  %v3334_v15 = vsel %vm1498_vm2, %v3321_v54, 0  ;;  %v6954_v54 = vpack.c.bf16 %v4030_v48, %v4023_v45 }
 0x6e6   :  { %v3408_v18 = vand.u32 4294901760, %v3334_v15 }
 0x6e7   :  { %v3419_v36 = vsub.f32 %v3337_v13, %v3418_v14 }
 0x6e8   :  { %v3409_v47 = vsub.f32 %v3334_v15, %v3408_v18 }
 0x6e9   :  { %v3420_v6 = vand.u32 4294901760, %v3419_v36 }
 0x6ea   :  { %v3410_v57 = vand.u32 4294901760, %v3409_v47 }
 0x6eb   :  { %v3421_v19 = vsub.f32 %v3419_v36, %v3420_v6 }
 0x6ec   :  { %v3411_v61 = vsub.f32 %v3409_v47, %v3410_v57 }
 0x6ed   :  { %v3422_v58 = vand.u32 4294901760, %v3421_v19  ;;  %v7906_v19 = vld [vmem:[#allocation2 + $0x1b8] ss:$0 sm:$0xff] }
 0x6ee   :  { %v3412_v63 = vand.u32 4294901760, %v3411_v61 }
 0x6f0   :  { %6180 = vmatprep.mubr.f32.mxu1 %v3412_v63 }
 0x6f1   :  { %6181 = vmatmul.mubr.f32.vlgmr.msra.gmra.mrb[12].mxu1 %v3422_v58 }
 0x6f2   :  { %6885 = vmatpush3.bf16.msra.mxu1 %v6882_v41  ;;  %6191 = vmatprep.mubr.f32.mxu1 %v3408_v18  ;;  %v7900_v41 = vpack.c.bf16 %v3941_v38, %v3938_v56  ;;  %v4466_v38 = vld [vmem:[#allocation2 + $0x188] sm:$0xff] }
 0x6f3   :  { %6887 = vmatprep.subr.bf16.mxu1 %v6886_v49 }
 0x6f6   :  { %6889 = vmatpush3.bf16.msra.mxu1 %v6886_v49  ;;  %v4024_v49 = vsub.f32 %v4022_v42, %v4023_v45  ;;  %v4496_v42 = vand.u32 4294901760, %v4466_v38 }
 0x6f7   :  { %6891 = vmatprep.subr.bf16.mxu1 %v6890_v50 }
 0x6f8   :  { %v4025_v52 = vand.u32 4294901760, %v4024_v49 }
 0x6f9   :  { %6192 = vmatmul.mubr.f32.vlgmr.msra.gmra.mrb[12].mxu1 %v3418_v14 }
 0x6fa   :  { %6893 = vmatpush3.bf16.msra.mxu1 %v6890_v50  ;;  %6202 = vmatprep.mubr.f32.mxu1 %v3409_v47  ;;  %v4031_v50 = vsub.f32 %v4029_v44, %v4030_v48  ;;  %v4468_v44 = vld [vmem:[#allocation2 + $0x198] sm:$0xff] }
 0x6fb   :  { %6895 = vmatprep.subr.bf16.mxu1 %v6894_v51  ;;  %v4502_v48 = vand.u32 4294901760, %v4468_v44 }
 0x6fe   :  { %6897 = vmatpush3.bf16.msra.mxu1 %v6894_v51  ;;  %v4036_v51 = vsub.f32 %v3918_v1, %v3938_v56  ;;  %v4464_v1 = vld [vmem:[#allocation2 + $0x178] sm:$0xff]  ;;  %v4465_v56 = vld [vmem:[#allocation2 + $0x180] sm:$0xff] }
 0x6ff   :  { %6899 = vmatprep.subr.bf16.mxu1 %v7870_v12  ;;  %v4490_v37 = vand.u32 4294901760, %v4464_v1 }
 0x700   :  { %v6942_v53 = vpack.c.bf16 %v4043_v22, %v4036_v51 }
 0x701   :  { %6203 = vmatmul.mubr.f32.vlgmr.msra.gmra.mrb[12].mxu1 %v3419_v36  ;;  %v7934_v24 = vpack.c.bf16 %v4490_v37, %v4487_v33 }
 0x702   :  { %6901 = vmatpush3.bf16.msra.mxu1 %v7870_v12  ;;  %6213 = vmatprep.mubr.f32.mxu1 %v3410_v57 }
 0x703   :  { %6903 = vmatprep.subr.bf16.mxu1 %v7872_v28 }
 0x706   :  { %6905 = vmatpush3.bf16.msra.mxu1 %v7872_v28 }
 0x707   :  { %6907 = vmatprep.subr.bf16.mxu1 %v6906_v23 }
 0x709   :  { %6214 = vmatmul.mubr.f32.vlgmr.msra.gmra.mrb[12].mxu1 %v3420_v6 }
 0x70a   :  { %6909 = vmatpush3.bf16.msra.mxu1 %v6906_v23  ;;  %6224 = vmatprep.mubr.f32.mxu1 %v3408_v18  ;;  %v4032_v23 = vand.u32 4294901760, %v4031_v50 }
 0x70b   :  { %6911 = vmatprep.subr.bf16.mxu1 %v6910_v25 }
 0x70c   :  { %v6930_v32 = vpack.c.bf16 %v4032_v23, %v4025_v52 }
 0x70e   :  { %6913 = vmatpush3.bf16.msra.mxu1 %v6910_v25  ;;  %v4037_v25 = vand.u32 4294901760, %v4036_v51 }
 0x70f   :  { %6915 = vmatprep.subr.bf16.mxu1 %v7870_v12 }
 0x710   :  { %v4038_v2 = vsub.f32 %v4036_v51, %v4037_v25  ;;  %v6958_v13 = vpack.c.bf16 %v4044_v26, %v4037_v25 }
 0x711   :  { %6225 = vmatmul.mubr.f32.vlgmr.msra.gmra.mrb[12].mxu1 %v3418_v14 }
 0x712   :  { %6917 = vmatpush3.bf16.msra.mxu1 %v7870_v12  ;;  %6235 = vmatprep.mubr.f32.mxu1 %v3408_v18  ;;  %v4039_v39 = vand.u32 4294901760, %v4038_v2  ;;  %v4596_v2 = vsub.f32 %v4464_v1, %v4490_v37 }
 0x713   :  { %6919 = vmatprep.subr.bf16.mxu1 %v7872_v28 }
 0x714   :  { %v6934_v21 = vpack.c.bf16 %v4046_v35, %v4039_v39 }
 0x716   :  { %6921 = vmatpush3.bf16.msra.mxu1 %v7872_v28 }
 0x717   :  { %6923 = vmatprep.subr.bf16.mxu1 %v7898_v40 }
 0x719   :  { %6236 = vmatmul.mubr.f32.vlgmr.msra.gmra.mrb[12].mxu1 %v3418_v14 }
 0x71a   :  { %6925 = vmatpush3.bf16.msra.mxu1 %v7898_v40 }
 0x71b   :  { %6927 = vmatprep.subr.bf16.mxu1 %v7900_v41 }
 0x71e   :  { %6929 = vmatpush3.bf16.msra.mxu1 %v7900_v41 }
 0x71f   :  { %6931 = vmatprep.subr.bf16.mxu1 %v6930_v32 }
 0x7ec   :  { %v6237_v3 = vpop.f32.mrb[12].mxu1 }
 0x7ed   :  { %v7070_v7 = vadd.f32 %v6237_v3, %v5111_v0  ;;  %v3857_v60 = vpop.f32.mrb[13].mxu1 }
 0x7ee   :  { %v7071_v43 = vadd.f32 %v5111_v0, %v3857_v60  ;;  %v7908_v0 = vld [vmem:[#allocation2 + $0x1c0] ss:$0 sm:$0xff] }
 0x7ef   :  { %v3884_v8 = vadd.f32 %v7070_v7, %v3880_v5 }
 0x7f0   :  { %v3883_v20 = vadd.f32 %v7071_v43, %v3878_v34 }
 0x7f1   :  { %v3888_v9 = vsel %vm1498_vm2, %v3884_v8, 0.0 }
 0x7f2   :  { %3889 = vadd.xlane.f32.xlu0 %v3888_v9  ;;  %v3885_v10 = vsel %vm1498_vm2, %v3883_v20, 0.0 }
 0x7f3   :  { %3886 = vadd.xlane.f32.xlu1 %v3885_v10 }
 0x87f   :  { %v3890_v11 = vpop.xlane.xlu0 %3889 }
 0x880   :  { %v3893_v16 = vmul.f32 0.03125, %v3890_v11  ;;  %v3887_v59 = vpop.xlane.xlu1 %3886 }
 0x881   :  { %v3892_v17 = vmul.f32 0.03125, %v3887_v59 }
 0x882   :  { %v3895_v27 = vsub.f32 %v3884_v8, %v3893_v16 }
 0x883   :  { %v3894_v12 = vsub.f32 %v3883_v20, %v3892_v17 }
 0x884   :  { %v3897_v28 = vmul.f32 %v3895_v27, %v3895_v27 }
 0x885   :  { %v3896_v29 = vmul.f32 %v3894_v12, %v3894_v12 }
 0x886   :  { %v3901_v55 = vsel %vm1498_vm2, %v3897_v28, 0.0  ;;  %v4461_v28 = vld [vmem:[#allocation2 + $0x160] sm:$0xff] }
 0x887   :  { %3902 = vadd.xlane.f32.xlu1 %v3901_v55  ;;  %v3898_v30 = vsel %vm1498_vm2, %v3896_v29, 0.0  ;;  %v4462_v29 = vld [vmem:[#allocation2 + $0x168] sm:$0xff]  ;;  %v4481_v55 = vand.u32 4294901760, %v4461_v28 }
 0x888   :  { %3899 = vadd.xlane.f32.xlu0 %v3898_v30  ;;  %v4484_v30 = vand.u32 4294901760, %v4462_v29 }
 0x889   :  { %v4575_v50 = vsub.f32 %v4461_v28, %v4481_v55 }
 0x88a   :  { %v7930_v62 = vpack.c.bf16 %v4484_v30, %v4481_v55  ;;  %v4582_v51 = vsub.f32 %v4462_v29, %v4484_v30 }
 0x88b   :  { %v4576_v52 = vand.u32 4294901760, %v4575_v50 }
 0x88c   :  { %6971 = vmatprep.subr.bf16.mxu0 %v7930_v62  ;;  %v4583_v23 = vand.u32 4294901760, %v4582_v51 }
 0x88d   :  { %6973 = vmatpush3.bf16.msra.mxu0 %v7930_v62  ;;  %v4577_v25 = vsub.f32 %v4575_v50, %v4576_v52 }
 0x88e   :  { %6975 = vmatprep.subr.bf16.mxu0 %v7934_v24  ;;  %v4584_v26 = vsub.f32 %v4582_v51, %v4583_v23  ;;  %v7034_v28 = vpack.c.bf16 %v4583_v23, %v4576_v52 }
 0x88f   :  { %v4578_v4 = vand.u32 4294901760, %v4577_v25 }
 0x890   :  { %v4585_v39 = vand.u32 4294901760, %v4584_v26 }
 0x891   :  { %6977 = vmatpush3.bf16.msra.mxu0 %v7934_v24 }
 0x914   :  { %v3903_v14 = vpop.xlane.xlu1 %3902 }
 0x915   :  { %v3905_v15 = vmul.f32 0.03125, %v3903_v14  ;;  %v3900_v18 = vpop.xlane.xlu0 %3899  ;;  %v4610_v14 = vsub.f32 %v4466_v38, %v4496_v42 }
 0x916   :  { %v3904_v36 = vmul.f32 0.03125, %v3900_v18 }
 0x917   :  { %v3907_v47 = vadd.f32 1e-05, %v3905_v15 }
 0x918   :  { %v3906_v6 = vadd.f32 1e-05, %v3904_v36 }
 0x919   :  { %7198 = vrsqrt.f32 %v3907_v47  ;;  %v4611_v47 = vand.u32 4294901760, %v4610_v14 }
 0x91a   :  { %7200 = vrsqrt.f32 %v3906_v6 }
 0x923   :  { %v7199_v57 = vpop.eup %7198 }
 0x924   :  { %v7201_v61 = vpop.eup %7200  ;;  %v3911_v63 = vmul.f32 %v7199_v57, %v3895_v27 }
 0x925   :  { %v3910_v58 = vmul.f32 %v7201_v61, %v3894_v12 }
 0x926   :  { %v3913_v3 = vmul.f32 %v7906_v19, %v3911_v63  ;;  %v4624_v63 = vsub.f32 %v4468_v44, %v4502_v48 }
 0x927   :  { %v3912_v5 = vmul.f32 %v7906_v19, %v3910_v58  ;;  %v4612_v58 = vsub.f32 %v4610_v14, %v4611_v47 }
 0x928   :  { %v7913_v7 = vadd.f32 %v7908_v0, %v3913_v3 }
 0x929   :  { %v7916_v60 = vadd.f32 %v7908_v0, %v3912_v5 }
 0x92a   :  { %v3929_v34 = vsel %vm1498_vm2, %v7913_v7, 0 }
 0x92b   :  { %v3926_v43 = vsel %vm1498_vm2, %v7916_v60, 0  ;;  %v4010_v8 = vand.u32 4294901760, %v3929_v34 }
 0x92c   :  { %v4000_v20 = vand.u32 4294901760, %v3926_v43 }
 0x92d   :  { %v4011_v9 = vsub.f32 %v3929_v34, %v4010_v8  ;;  %v4625_v34 = vand.u32 4294901760, %v4624_v63 }
 0x92e   :  { %v4001_v10 = vsub.f32 %v3926_v43, %v4000_v20  ;;  %v4613_v43 = vand.u32 4294901760, %v4612_v58 }
 0x92f   :  { %v4012_v11 = vand.u32 4294901760, %v4011_v9 }
 0x930   :  { %v4002_v16 = vand.u32 4294901760, %v4001_v10 }
 0x931   :  { %v4013_v59 = vsub.f32 %v4011_v9, %v4012_v11 }
 0x932   :  { %v4003_v17 = vsub.f32 %v4001_v10, %v4002_v16 }
 0x933   :  { %v4014_v12 = vand.u32 4294901760, %v4013_v59  ;;  %v7002_v59 = vpack.c.bf16 %v4582_v51, %v4575_v50 }
 0x934   :  { %v4004_v27 = vand.u32 4294901760, %v4003_v17 }
 0x936   :  { %6246 = vmatprep.mubr.f32.mxu1 %v4004_v27 }
 0x937   :  { %6247 = vmatmul.mubr.f32.vlgmr.msra.gmra.mrb[14].mxu1 %v4014_v12 }
 0x938   :  { %6933 = vmatpush3.bf16.msra.mxu1 %v6930_v32  ;;  %6257 = vmatprep.mubr.f32.mxu1 %v4000_v20  ;;  %v4589_v32 = vsub.f32 %v4463_v31, %v4487_v33  ;;  %v5114_v31 = vld [vmem:[#allocation2 + $0x1c8] ss:$0 sm:$0xff] }
 0x939   :  { %6935 = vmatprep.subr.bf16.mxu1 %v6934_v21 }
 0x93a   :  { %v4590_v35 = vand.u32 4294901760, %v4589_v32  ;;  %v7006_v17 = vpack.c.bf16 %v4596_v2, %v4589_v32 }
 0x93c   :  { %6937 = vmatpush3.bf16.msra.mxu1 %v6934_v21  ;;  %v4597_v21 = vand.u32 4294901760, %v4596_v2 }
 0x93d   :  { %6939 = vmatprep.subr.bf16.mxu1 %v6938_v46 }
 0x93e   :  { %v7038_v29 = vpack.c.bf16 %v4597_v21, %v4590_v35 }
 0x93f   :  { %6258 = vmatmul.mubr.f32.vlgmr.msra.gmra.mrb[14].mxu1 %v4010_v8 }
 0x940   :  { %6941 = vmatpush3.bf16.msra.mxu1 %v6938_v46  ;;  %6268 = vmatprep.mubr.f32.mxu1 %v4001_v10  ;;  %v6986_v46 = vpack.c.bf16 %v4585_v39, %v4578_v4 }
 0x941   :  { %6943 = vmatprep.subr.bf16.mxu1 %v6942_v53 }
 0x944   :  { %6945 = vmatpush3.bf16.msra.mxu1 %v6942_v53  ;;  %v4591_v53 = vsub.f32 %v4589_v32, %v4590_v35 }
 0x945   :  { %6947 = vmatprep.subr.bf16.mxu1 %v7898_v40 }
 0x946   :  { %v4592_v15 = vand.u32 4294901760, %v4591_v53 }
 0x947   :  { %6269 = vmatmul.mubr.f32.vlgmr.msra.gmra.mrb[14].mxu1 %v4011_v9 }
 0x948   :  { %6949 = vmatpush3.bf16.msra.mxu1 %v7898_v40  ;;  %6279 = vmatprep.mubr.f32.mxu1 %v4002_v16 }
 0x949   :  { %6951 = vmatprep.subr.bf16.mxu1 %v7900_v41 }
 0x94c   :  { %6953 = vmatpush3.bf16.msra.mxu1 %v7900_v41 }
 0x94d   :  { %6955 = vmatprep.subr.bf16.mxu1 %v6954_v54 }
 0x94f   :  { %6280 = vmatmul.mubr.f32.vlgmr.msra.gmra.mrb[14].mxu1 %v4012_v11 }
 0x950   :  { %6957 = vmatpush3.bf16.msra.mxu1 %v6954_v54  ;;  %6290 = vmatprep.mubr.f32.mxu1 %v4000_v20  ;;  %v4598_v54 = vsub.f32 %v4596_v2, %v4597_v21  ;;  %v5115_v2 = vld [vmem:[#allocation2 + $0x1d0] ss:$0 sm:$0xff] }
 0x951   :  { %6959 = vmatprep.subr.bf16.mxu1 %v6958_v13 }
 0x952   :  { %v4599_v18 = vand.u32 4294901760, %v4598_v54 }
 0x954   :  { %6961 = vmatpush3.bf16.msra.mxu1 %v6958_v13  ;;  %v6990_v6 = vpack.c.bf16 %v4599_v18, %v4592_v15 }
 0x955   :  { %6963 = vmatprep.subr.bf16.mxu1 %v7898_v40 }
 0x957   :  { %6291 = vmatmul.mubr.f32.vlgmr.msra.gmra.mrb[14].mxu1 %v4010_v8 }
 0x958   :  { %6965 = vmatpush3.bf16.msra.mxu1 %v7898_v40  ;;  %6301 = vmatprep.mubr.f32.mxu1 %v4000_v20  ;;  %v4467_v40 = vld [vmem:[#allocation2 + $0x190] sm:$0xff]  ;;  %v4626_v20 = vsub.f32 %v4624_v63, %v4625_v34 }
 0x959   :  { %6967 = vmatprep.subr.bf16.mxu1 %v7900_v41  ;;  %v4499_v45 = vand.u32 4294901760, %v4467_v40 }
 0x95a   :  { %v4627_v11 = vand.u32 4294901760, %v4626_v20 }
 0x95b   :  { %v7940_v22 = vpack.c.bf16 %v4502_v48, %v4499_v45  ;;  %v4617_v61 = vsub.f32 %v4467_v40, %v4499_v45 }
 0x95c   :  { %6969 = vmatpush3.bf16.msra.mxu1 %v7900_v41  ;;  %v4493_v41 = vand.u32 4294901760, %v4465_v56 }
 0x95d   :  { %v4618_v5 = vand.u32 4294901760, %v4617_v61  ;;  %v7014_v12 = vpack.c.bf16 %v4624_v63, %v4617_v61 }
 0x95e   :  { %v7938_v49 = vpack.c.bf16 %v4496_v42, %v4493_v41  ;;  %v4603_v13 = vsub.f32 %v4465_v56, %v4493_v41 }
 0x95f   :  { %6302 = vmatmul.mubr.f32.vlgmr.msra.gmra.mrb[14].mxu1 %v4010_v8  ;;  %v4619_v8 = vsub.f32 %v4617_v61, %v4618_v5  ;;  %v7046_v30 = vpack.c.bf16 %v4625_v34, %v4618_v5 }
 0x960   :  { %6979 = vmatprep.subr.bf16.mxu0 %v7938_v49  ;;  %v4604_v36 = vand.u32 4294901760, %v4603_v13  ;;  %v7010_v27 = vpack.c.bf16 %v4610_v14, %v4603_v13 }
 0x961   :  { %6981 = vmatpush3.bf16.msra.mxu0 %v7938_v49  ;;  %v4620_v10 = vand.u32 4294901760, %v4619_v8 }
 0x962   :  { %6983 = vmatprep.subr.bf16.mxu0 %v7940_v22  ;;  %v4605_v57 = vsub.f32 %v4603_v13, %v4604_v36  ;;  %v7042_v55 = vpack.c.bf16 %v4611_v47, %v4604_v36 }
 0x963   :  { %v6998_v16 = vpack.c.bf16 %v4627_v11, %v4620_v10 }
 0x964   :  { %v4606_v3 = vand.u32 4294901760, %v4605_v57 }
 0x965   :  { %6985 = vmatpush3.bf16.msra.mxu0 %v7940_v22 }
 0x966   :  { %6987 = vmatprep.subr.bf16.mxu0 %v6986_v46  ;;  %v6994_v9 = vpack.c.bf16 %v4613_v43, %v4606_v3 }
 0xa32   :  { %v6303_v1 = vpop.f32.mrb[14].mxu1 }
 0xa33   :  { %v7072_v33 = vadd.f32 %v6303_v1, %v5114_v31  ;;  %v4449_v37 = vpop.f32.mrb[15].mxu1 }
 0xa34   :  { %v7073_v56 = vadd.f32 %v5114_v31, %v4449_v37 }
 0xa35   :  { %v4460_v38 = vmax.f32 %v7072_v33, 0.0 }
 0xa36   :  { %v4459_v40 = vmax.f32 %v7073_v56, 0.0 }
 0xa37   :  { %v4478_v41 = vsel %vm2107_vm3, %v4460_v38, 0 }
 0xa38   :  { %v4563_v42 = vand.u32 4294901760, %v4478_v41  ;;  %v4475_v44 = vsel %vm2107_vm3, %v4459_v40, 0 }
 0xa39   :  { %v4553_v45 = vand.u32 4294901760, %v4475_v44 }
 0xa3a   :  { %v4564_v48 = vsub.f32 %v4478_v41, %v4563_v42 }
 0xa3b   :  { %v4554_v50 = vsub.f32 %v4475_v44, %v4553_v45 }
 0xa3c   :  { %v4565_v51 = vand.u32 4294901760, %v4564_v48 }
 0xa3d   :  { %v4555_v52 = vand.u32 4294901760, %v4554_v50 }
 0xa3e   :  { %v4566_v23 = vsub.f32 %v4564_v48, %v4565_v51 }
 0xa3f   :  { %v4556_v25 = vsub.f32 %v4554_v50, %v4555_v52 }
 0xa40   :  { %v4567_v32 = vand.u32 4294901760, %v4566_v23 }
 0xa41   :  { %v4557_v26 = vand.u32 4294901760, %v4556_v25 }
 0xa43   :  { %6320 = vmatprep.mubr.f32.mxu0 %v4557_v26 }
 0xa44   :  { %6321 = vmatmul.mubr.f32.vlgmr.msra.gmra.mrb[6].mxu0 %v4567_v32 }
 0xa45   :  { %6989 = vmatpush3.bf16.msra.mxu0 %v6986_v46  ;;  %6339 = vmatprep.mubr.f32.mxu0 %v4553_v45 }
 0xa46   :  { %6991 = vmatprep.subr.bf16.mxu0 %v6990_v6 }
 0xa49   :  { %6993 = vmatpush3.bf16.msra.mxu0 %v6990_v6 }
 0xa4a   :  { %6995 = vmatprep.subr.bf16.mxu0 %v6994_v9 }
 0xa4d   :  { %6997 = vmatpush3.bf16.msra.mxu0 %v6994_v9 }
 0xa4e   :  { %6999 = vmatprep.subr.bf16.mxu0 %v6998_v16 }
 0xa51   :  { %7001 = vmatpush3.bf16.msra.mxu0 %v6998_v16 }
 0xa52   :  { %7003 = vmatprep.subr.bf16.mxu0 %v7002_v59 }
 0xa54   :  { %6340 = vmatmul.mubr.f32.vlgmr.msra.gmra.mrb[6].mxu0 %v4563_v42 }
 0xa55   :  { %7005 = vmatpush3.bf16.msra.mxu0 %v7002_v59  ;;  %6358 = vmatprep.mubr.f32.mxu0 %v4554_v50 }
 0xa56   :  { %7007 = vmatprep.subr.bf16.mxu0 %v7006_v17 }
 0xa59   :  { %7009 = vmatpush3.bf16.msra.mxu0 %v7006_v17 }
 0xa5a   :  { %7011 = vmatprep.subr.bf16.mxu0 %v7010_v27 }
 0xa5d   :  { %7013 = vmatpush3.bf16.msra.mxu0 %v7010_v27 }
 0xa5e   :  { %7015 = vmatprep.subr.bf16.mxu0 %v7014_v12 }
 0xa61   :  { %7017 = vmatpush3.bf16.msra.mxu0 %v7014_v12 }
 0xa62   :  { %7019 = vmatprep.subr.bf16.mxu0 %v7930_v62 }
 0xa64   :  { %6359 = vmatmul.mubr.f32.vlgmr.msra.gmra.mrb[6].mxu0 %v4564_v48 }
 0xa65   :  { %7021 = vmatpush3.bf16.msra.mxu0 %v7930_v62  ;;  %6377 = vmatprep.mubr.f32.mxu0 %v4555_v52 }
 0xa66   :  { %7023 = vmatprep.subr.bf16.mxu0 %v7934_v24 }
 0xa69   :  { %7025 = vmatpush3.bf16.msra.mxu0 %v7934_v24 }
 0xa6a   :  { %7027 = vmatprep.subr.bf16.mxu0 %v7938_v49 }
 0xa6d   :  { %7029 = vmatpush3.bf16.msra.mxu0 %v7938_v49 }
 0xa6e   :  { %7031 = vmatprep.subr.bf16.mxu0 %v7940_v22 }
 0xa71   :  { %7033 = vmatpush3.bf16.msra.mxu0 %v7940_v22 }
 0xa72   :  { %7035 = vmatprep.subr.bf16.mxu0 %v7034_v28 }
 0xa74   :  { %6378 = vmatmul.mubr.f32.vlgmr.msra.gmra.mrb[6].mxu0 %v4565_v51 }
 0xa75   :  { %7037 = vmatpush3.bf16.msra.mxu0 %v7034_v28  ;;  %6396 = vmatprep.mubr.f32.mxu0 %v4553_v45 }
 0xa76   :  { %7039 = vmatprep.subr.bf16.mxu0 %v7038_v29 }
 0xa79   :  { %7041 = vmatpush3.bf16.msra.mxu0 %v7038_v29 }
 0xa7a   :  { %7043 = vmatprep.subr.bf16.mxu0 %v7042_v55 }
 0xa7d   :  { %7045 = vmatpush3.bf16.msra.mxu0 %v7042_v55 }
 0xa7e   :  { %7047 = vmatprep.subr.bf16.mxu0 %v7046_v30 }
 0xa81   :  { %7049 = vmatpush3.bf16.msra.mxu0 %v7046_v30 }
 0xa82   :  { %7051 = vmatprep.subr.bf16.mxu0 %v7930_v62 }
 0xa84   :  { %6397 = vmatmul.mubr.f32.vlgmr.msra.gmra.mrb[6].mxu0 %v4563_v42 }
 0xa85   :  { %7053 = vmatpush3.bf16.msra.mxu0 %v7930_v62  ;;  %6415 = vmatprep.mubr.f32.mxu0 %v4553_v45 }
 0xa86   :  { %7055 = vmatprep.subr.bf16.mxu0 %v7934_v24 }
 0xa89   :  { %7057 = vmatpush3.bf16.msra.mxu0 %v7934_v24 }
 0xa8a   :  { %7059 = vmatprep.subr.bf16.mxu0 %v7938_v49 }
 0xa8d   :  { %7061 = vmatpush3.bf16.msra.mxu0 %v7938_v49 }
 0xa8e   :  { %7063 = vmatprep.subr.bf16.mxu0 %v7940_v22 }
 0xa91   :  { %7065 = vmatpush3.bf16.msra.mxu0 %v7940_v22 }
 0xa94   :  { %6416 = vmatmul.mubr.f32.vlgmr.msra.gmra.mrb[6].mxu0 %v4563_v42 }
 0xb67   :  { %v6417_v4 = vpop.f32.mrb[6].mxu0 }
 0xb68   :  { %v7074_v39 = vadd.f32 %v6417_v4, %v5115_v2  ;;  %v5050_v35 = vpop.f32.mrb[7].mxu0 }
 0xb69   :  { %v7075_v21 = vadd.f32 %v5115_v2, %v5050_v35 }
 0xb6a   :  { %v5061_v62 = vadd.f32 %v7074_v39, %v7913_v7 }
 0xb6b   :  { %v5060_v46 = vadd.f32 %v7075_v21, %v7916_v60 }
 0xb6c   :  { %v5065_v24 = vsel %vm1498_vm2, %v5061_v62, 0.0 }
 0xb6d   :  { %5066 = vadd.xlane.f32.xlu1 %v5065_v24  ;;  %v5062_v53 = vsel %vm1498_vm2, %v5060_v46, 0.0 }
 0xb6e   :  { %5063 = vadd.xlane.f32.xlu0 %v5062_v53 }
 0xbfa   :  { %v5067_v49 = vpop.xlane.xlu1 %5066 }
 0xbfb   :  { %v5069_v54 = vmul.f32 0.03125, %v5067_v49  ;;  %v5064_v13 = vpop.xlane.xlu0 %5063 }
 0xbfc   :  { %v5068_v22 = vmul.f32 0.03125, %v5064_v13 }
 0xbfd   :  { %v5071_v14 = vsub.f32 %v5061_v62, %v5069_v54 }
 0xbfe   :  { %v5070_v15 = vsub.f32 %v5060_v46, %v5068_v22 }
 0xbff   :  { %v5073_v18 = vmul.f32 %v5071_v14, %v5071_v14 }
 0xc00   :  { %v5072_v36 = vmul.f32 %v5070_v15, %v5070_v15 }
 0xc01   :  { %v5077_v47 = vsel %vm1498_vm2, %v5073_v18, 0.0 }
 0xc02   :  { %5078 = vadd.xlane.f32.xlu1 %v5077_v47  ;;  %v5074_v7 = vsel %vm1498_vm2, %v5072_v36, 0.0 }
 0xc03   :  { %5075 = vadd.xlane.f32.xlu0 %v5074_v7 }
 0xc8f   :  { %v5079_v60 = vpop.xlane.xlu1 %5078 }
 0xc90   :  { %v5081_v6 = vmul.f32 0.03125, %v5079_v60  ;;  %v5076_v57 = vpop.xlane.xlu0 %5075 }
 0xc91   :  { %v5080_v61 = vmul.f32 0.03125, %v5076_v57 }
 0xc92   :  { %v5083_v63 = vadd.f32 1e-05, %v5081_v6 }
 0xc93   :  { %v5082_v58 = vadd.f32 1e-05, %v5080_v61 }
 0xc94   :  { %7202 = vrsqrt.f32 %v5083_v63 }
 0xc95   :  { %7204 = vrsqrt.f32 %v5082_v58 }
 0xc9e   :  { %v7203_v3 = vpop.eup %7202 }
 0xc9f   :  { %v7205_v5 = vpop.eup %7204  ;;  %v5087_v34 = vmul.f32 %v7203_v3, %v5071_v14 }
 0xca0   :  { %v5086_v43 = vmul.f32 %v7205_v5, %v5070_v15 }
 0xca1   :  { %v5089_v8 = vmul.f32 %v7906_v19, %v5087_v34 }
 0xca2   :  { %v5088_v20 = vmul.f32 %v7906_v19, %v5086_v43 }
 0xca3   :  { %v5091_v9 = vadd.f32 %v7908_v0, %v5089_v8 }
 0xca4   :  { %v5090_v10 = vadd.f32 %v7908_v0, %v5088_v20 }
 0xca5   :  { %5093 = vst.msk [vmem:[#allocation5 + $0x8] sm:$0xff] %vm1498_vm2, %v5091_v9 }
 0xca6   :  { %5092 = vst.msk [vmem:[#allocation5] sm:$0xff] %vm1498_vm2, %v5090_v10 }
 0xca7   :  { %7241 = shalt.err (!%p7238_p12)
}
 0xca8   :  { %s7242_s8 = scalar_lea.hbm %s7993_s2, 256 }
 0xca9   :  { %p7243_p13 = scmp.ne.s32.totalorder %s7993_s2, %s7242_s8  ;;  %p7246_p0 = scmp.lt.u32.totalorder %s7242_s8, %s7993_s2 }
 0xcab   :  { %p7248_p1 = pnand %p7246_p0, %p7243_p13 }
 0xcad   :  { %7251 = shalt.err (!%p7248_p1)
}
 0xcae   :  { %5105 = dma.vmem_to_hbm [thread:$0]  %s5100_s4, 256, %s7993_s2, [#allocation4], %s7257_s19, %s7257_s19, %s7258_s20  }
 0xcaf   :  { %7254 = dma.done.wait [#allocation4], 256  }
 0xcb0   :  { %7255 = vsyncadd [#allocation4], 4294967040 }
 0xcb1   :  { %5109 = vsyncpa [#allocation3], 1 }
 0xcb2   :  { %5110 = vsyncpa [#allocation4], 1 }

</bundles_post_ra>
